<compile_context>
chip_gen: v7x
topology: tpu7x:2x2x1
jax: 0.10.0
libtpu: 0.0.40
codegen_flags: <defaults>
</compile_context>

<pallas_src>
import functools

import jax
import jax.numpy as jnp
from jax.experimental import pallas as pl
from jax.experimental.pallas import tpu as pltpu

HIDDEN = 128  # 2 ** 7


def _round_up(x, m):
    return ((x + m - 1) // m) * m


def _make_kernel(compute_dtype):
    cdt = jnp.dtype(compute_dtype)

    def kernel(x_ref, w1_ref, w2_ref, w3t_ref, b_ref, o_ref):
        """One batch tile of the fused 3-layer MLP.

        x_ref  : (bm, D)    source dtype (cast to compute dtype in-kernel)
        w1_ref : (D, 128)   compute dtype
        w2_ref : (128, 128) compute dtype
        w3t_ref: (8, 128)   compute dtype; row 0 = w3^T, rows 1..7 zero (MXU row pad)
        b_ref  : (3, 128)   f32; row 0 = b1, row 1 = b2, row 2 lane 0 = b3
        o_ref  : (1, bm)    f32; lane-dense row of per-example outputs
        """
        x = x_ref[...].astype(cdt)              # in-kernel cast (VPU), no extra HBM pass
        b1 = b_ref[0:1, :]                      # (1, 128) f32
        b2 = b_ref[1:2, :]                      # (1, 128) f32
        b3 = b_ref[2:3, 0:1]                    # (1, 1)   f32

        # Layer 1: (bm, D) @ (D, 128) on the MXU, f32 accumulation; bias + ReLU on VPU.
        h1 = jnp.dot(x, w1_ref[...], preferred_element_type=jnp.float32) + b1
        h1 = jnp.maximum(h1, 0.0)

        # Layer 2: (bm, 128) @ (128, 128) on the MXU, f32 accumulation.
        h2 = jnp.dot(h1.astype(cdt), w2_ref[...],
                     preferred_element_type=jnp.float32) + b2
        h2 = jnp.maximum(h2, 0.0)

        # Layer 3 (128 -> 1): contract the feature dim of both operands ("x @ W^T")
        # so per-row scalars come out lane-dense as row 0 of an (8, bm) result.
        out8 = jax.lax.dot_general(
            w3t_ref[...], h2.astype(cdt),
            dimension_numbers=(((1,), (1,)), ((), ())),
            preferred_element_type=jnp.float32)               # (8, bm)
        o_ref[...] = (out8[0:1, :] + b3).astype(o_ref.dtype)  # (1, bm)

    return kernel


def privacy_operator_forward(x, params, *, bm_max=8192,
                             compute_dtype=jnp.bfloat16,
                             vmem_tile_budget_bytes=None):
    """Forward pass of PrivacyOperator.  x: (B, data_dim).  Returns (B, 1) f32.

    compute_dtype controls matmul-input precision (accumulation is always f32).
    bf16 (default) follows v6e/v7x perf guidance; jnp.float32 gives exact PyTorch-f32
    semantics.
    """
    w1, b1, w2, b2, w3, b3 = params
    B, D = x.shape
    H = HIDDEN
    assert w1.shape == (D, H) and w2.shape == (H, H) and w3.shape == (H, 1)

    cdt = jnp.dtype(compute_dtype)
    cb = cdt.itemsize
    xb = jnp.dtype(x.dtype).itemsize

    # --- Generation-aware VMEM budgeting (v7x has 64 MiB/TC vs 128 MiB on v5e/v6e).
    try:
        info = pltpu.get_tpu_info()
        vmem_cap = int(getattr(info, "vmem_capacity_bytes", 128 * 1024 * 1024))
    except Exception:
        vmem_cap = 128 * 1024 * 1024
    if vmem_tile_budget_bytes is None:
        vmem_tile_budget_bytes = min(40 * 1024 * 1024, (vmem_cap * 3) // 8)
    vmem_limit_cap = (vmem_cap * 3) // 4

    def footprint(t):
        x_stream = 2 * t * D * xb                        # double-buffered x tiles
        x_cast = t * D * cb if cb != xb else 0           # in-kernel cast copy
        weights = (D * H + H * H + 8 * H) * cb + 8 * H * 4   # single-buffered weights+bias
        inter_f32 = 2 * t * H * 4                        # h1, h2 (f32)
        inter_cd = (2 * t * H * cb) if cb != 4 else 0    # compute-dtype copies for MXU
        out8 = 8 * t * 4                                 # (8, bm) f32 layer-3 result
        out_stream = 2 * 8 * t * 4                       # (1, bm) out tiles (sublane-padded)
        headroom = 2 * 1024 * 1024                       # Mosaic internal scratch
        return (x_stream + x_cast + weights + inter_f32 + inter_cd
                + out8 + out_stream + headroom)

    # --- Batch tile: multiple of 256, grown toward the VMEM budget, capped so the
    #     grid keeps >= min(4, ceil(B/256)) steps (v7x megacore + pipeline overlap).
    bm_eff = max(256, min(_round_up(int(bm_max), 256), _round_up(B, 256)))
    min_tiles = min(4, pl.cdiv(B, 256))
    if min_tiles > 1:
        bm_eff = min(bm_eff, max(256, _round_up(pl.cdiv(B, min_tiles), 256)))
    while bm_eff > 256 and footprint(bm_eff) > vmem_tile_budget_bytes:
        bm_eff -= 256
    num_tiles = pl.cdiv(B, bm_eff)

    # --- Weight/bias packing (tiny; pure layout plumbing).
    w1_c = w1.astype(cdt)
    w2_c = w2.astype(cdt)
    w3t = jnp.zeros((8, H), cdt).at[0, :].set(w3[:, 0].astype(cdt))
    b_all = jnp.zeros((3, H), jnp.float32)
    b_all = b_all.at[0, :].set(b1.reshape(-1).astype(jnp.float32))
    b_all = b_all.at[1, :].set(b2.reshape(-1).astype(jnp.float32))
    b_all = b_all.at[2, 0].set(b3.reshape(-1)[0].astype(jnp.float32))

    flops = 2 * B * (D * H + H * H + 8 * H)
    bytes_accessed = (B * D * xb + (D * H + H * H + 8 * H) * cb
                      + 3 * H * 4 + B * 4)
    vmem_limit = int(min(vmem_limit_cap,
                         max(32 * 1024 * 1024,
                             footprint(bm_eff) + footprint(bm_eff) // 2)))

    kernel = _make_kernel(cdt)

    def build(single_buffer_weights):
        w_kwargs = ({"pipeline_mode": pl.Buffered(1)}
                    if single_buffer_weights else {})
        grid_spec = pltpu.PrefetchScalarGridSpec(
            num_scalar_prefetch=0,
            grid=(num_tiles,),
            in_specs=[
                pl.BlockSpec((bm_eff, D), lambda i: (i, 0)),              # x tile
                pl.BlockSpec((D, H), lambda i: (0, 0), **w_kwargs),       # w1 (resident)
                pl.BlockSpec((H, H), lambda i: (0, 0), **w_kwargs),       # w2 (resident)
                pl.BlockSpec((8, H), lambda i: (0, 0), **w_kwargs),       # w3^T (padded)
                pl.BlockSpec((3, H), lambda i: (0, 0), **w_kwargs),       # packed biases
            ],
            out_specs=pl.BlockSpec((1, bm_eff), lambda i: (0, i)),
        )
        return pl.pallas_call(
            kernel,
            out_shape=jax.ShapeDtypeStruct((1, B), jnp.float32),
            grid_spec=grid_spec,
            compiler_params=pltpu.CompilerParams(
                dimension_semantics=("parallel",),
                vmem_limit_bytes=vmem_limit,
            ),
            cost_estimate=pl.CostEstimate(
                flops=flops, transcendentals=0, bytes_accessed=bytes_accessed),
        )

    try:
        out_row = build(True)(x, w1_c, w2_c, w3t, b_all)
    except Exception:
        # pipeline_mode=pl.Buffered(1) support can vary across jax versions; fall
        # back to default (double-buffered) weight streams, which is also correct.
        out_row = build(False)(x, w1_c, w2_c, w3t, b_all)

    # Ragged-tail rows beyond B are never written (Pallas masks partial blocks).
    return out_row.reshape(B, 1)


def init_params(data_dim, key):
    """Deterministic init mimicking nn.Linear's U(-1/sqrt(fan_in), 1/sqrt(fan_in)).
    Weights stored as (in_features, out_features); biases as (1, out_features)."""
    ks = jax.random.split(key, 6)

    def lin(kw, kb, fan_in, fan_out):
        bound = 1.0 / jnp.sqrt(jnp.float32(fan_in))
        w = jax.random.uniform(kw, (fan_in, fan_out), jnp.float32, -bound, bound)
        b = jax.random.uniform(kb, (1, fan_out), jnp.float32, -bound, bound)
        return w, b

    w1, b1 = lin(ks[0], ks[1], data_dim, HIDDEN)
    w2, b2 = lin(ks[2], ks[3], HIDDEN, HIDDEN)
    w3, b3 = lin(ks[4], ks[5], HIDDEN, 1)
    return (w1, b1, w2, b2, w3, b3)


def _reference_forward(x, params, compute_dtype=jnp.float32):
    """Pure-JAX reference with the same precision policy as the kernel."""
    w1, b1, w2, b2, w3, b3 = params
    cd = compute_dtype
    h1 = jnp.dot(x.astype(cd), w1.astype(cd),
                 preferred_element_type=jnp.float32) + b1
    h1 = jnp.maximum(h1, 0.0)
    h2 = jnp.dot(h1.astype(cd), w2.astype(cd),
                 preferred_element_type=jnp.float32) + b2
    h2 = jnp.maximum(h2, 0.0)
    return jnp.dot(h2.astype(cd), w3.astype(cd),
                   preferred_element_type=jnp.float32) + b3


if __name__ == "__main__":
    key = jax.random.PRNGKey(0)
    k_x, k_p, k_x2 = jax.random.split(key, 3)

    # 1) Small demo, exact f32 path (matches PyTorch f32 semantics).
    batch, data_dim = 16, 32
    x = jax.random.normal(k_x, (batch, data_dim), dtype=jnp.float32)
    params = init_params(data_dim, k_p)

    out_f32 = privacy_operator_forward(x, params, compute_dtype=jnp.float32)
    out_f32 = jax.block_until_ready(out_f32)
    ref_f32 = _reference_forward(x, params, jnp.float32)
    assert out_f32.shape == (batch, 1)
    assert jnp.allclose(out_f32, ref_f32, atol=1e-3, rtol=1e-3)

    # 2) bf16 fast path: ragged batch (exercises masked partial tiles) + multi-step
    #    grid (min-tiles logic forces >= 3 steps here).
    batch2, data_dim2 = 600, 40
    x2 = jax.random.normal(k_x2, (batch2, data_dim2), dtype=jnp.float32)
    params2 = init_params(data_dim2, k_p)

    out_bf16 = privacy_operator_forward(x2, params2, compute_dtype=jnp.bfloat16)
    out_bf16 = jax.block_until_ready(out_bf16)
    ref_bf16 = _reference_forward(x2, params2, jnp.bfloat16)
    assert out_bf16.shape == (batch2, 1)
    assert jnp.allclose(out_bf16, ref_bf16, atol=2e-2, rtol=2e-2)

    print("KERNEL_OK")
</pallas_src>

<mosaic_0001>
module attributes {stable_mosaic.version = 11 : i64} {
  func.func @kernel(%arg0: i32, %arg1: memref<256x32xf32, #tpu.memory_space<vmem>>, %arg2: memref<32x128xf32, #tpu.memory_space<vmem>>, %arg3: memref<128x128xf32, #tpu.memory_space<vmem>>, %arg4: memref<8x128xf32, #tpu.memory_space<vmem>>, %arg5: memref<3x128xf32, #tpu.memory_space<vmem>>, %arg6: memref<1x256xf32, #tpu.memory_space<vmem>>) attributes {dimension_semantics = [#tpu.dimension_semantics<parallel>], iteration_bounds = array<i64: 1>, scalar_prefetch = 0 : i64, scratch_operands = 0 : i64, tpu.core_type = #tpu.core_type<tc>, window_params = [{transform_indices = @transform_0, window_bounds = array<i64: 256, 32>}, {pipeline_mode = #tpu.pipeline_mode<synchronous>, transform_indices = @transform_1, window_bounds = array<i64: 32, 128>}, {pipeline_mode = #tpu.pipeline_mode<synchronous>, transform_indices = @transform_2, window_bounds = array<i64: 128, 128>}, {pipeline_mode = #tpu.pipeline_mode<synchronous>, transform_indices = @transform_3, window_bounds = array<i64: 8, 128>}, {pipeline_mode = #tpu.pipeline_mode<synchronous>, transform_indices = @transform_4, window_bounds = array<i64: 3, 128>}, {transform_indices = @transform_5, window_bounds = array<i64: 1, 256>}]} {
    %c0 = arith.constant 0 : index
    %c0_0 = arith.constant 0 : index
    %0 = vector.load %arg1[%c0, %c0_0] : memref<256x32xf32, #tpu.memory_space<vmem>>, vector<256x32xf32>
    %c0_1 = arith.constant 0 : index
    %c0_2 = arith.constant 0 : index
    %1 = vector.load %arg5[%c0_1, %c0_2] : memref<3x128xf32, #tpu.memory_space<vmem>>, vector<1x128xf32>
    %c1 = arith.constant 1 : index
    %c0_3 = arith.constant 0 : index
    %2 = vector.load %arg5[%c1, %c0_3] : memref<3x128xf32, #tpu.memory_space<vmem>>, vector<1x128xf32>
    %c2 = arith.constant 2 : index
    %c0_4 = arith.constant 0 : index
    %3 = vector.load %arg5[%c2, %c0_4] : memref<3x128xf32, #tpu.memory_space<vmem>>, vector<1x1xf32>
    %c0_5 = arith.constant 0 : index
    %c0_6 = arith.constant 0 : index
    %4 = vector.load %arg2[%c0_5, %c0_6] : memref<32x128xf32, #tpu.memory_space<vmem>>, vector<32x128xf32>
    %cst = arith.constant dense<0.000000e+00> : vector<256x128xf32>
    %5 = tpu.matmul %0, %4, %cst {dimension_numbers = #tpu.dot_dimension_numbers<[1], [0], [0], [1], [0, 0, 1, 1], [], []>} : vector<256x32xf32>, vector<32x128xf32>, vector<256x128xf32> -> vector<256x128xf32>
    %6 = vector.broadcast %1 : vector<1x128xf32> to vector<256x128xf32>
    %7 = arith.addf %5, %6 : vector<256x128xf32>
    %cst_7 = arith.constant 0.000000e+00 : f32
    %8 = vector.broadcast %cst_7 : f32 to vector<256x128xf32>
    %9 = arith.maximumf %7, %8 : vector<256x128xf32>
    %c0_8 = arith.constant 0 : index
    %c0_9 = arith.constant 0 : index
    %10 = vector.load %arg3[%c0_8, %c0_9] : memref<128x128xf32, #tpu.memory_space<vmem>>, vector<128x128xf32>
    %cst_10 = arith.constant dense<0.000000e+00> : vector<256x128xf32>
    %11 = tpu.matmul %9, %10, %cst_10 {dimension_numbers = #tpu.dot_dimension_numbers<[1], [0], [0], [1], [0, 0, 1, 1], [], []>} : vector<256x128xf32>, vector<128x128xf32>, vector<256x128xf32> -> vector<256x128xf32>
    %12 = vector.broadcast %2 : vector<1x128xf32> to vector<256x128xf32>
    %13 = arith.addf %11, %12 : vector<256x128xf32>
    %cst_11 = arith.constant 0.000000e+00 : f32
    %14 = vector.broadcast %cst_11 : f32 to vector<256x128xf32>
    %15 = arith.maximumf %13, %14 : vector<256x128xf32>
    %c0_12 = arith.constant 0 : index
    %c0_13 = arith.constant 0 : index
    %16 = vector.load %arg4[%c0_12, %c0_13] : memref<8x128xf32, #tpu.memory_space<vmem>>, vector<8x128xf32>
    %cst_14 = arith.constant dense<0.000000e+00> : vector<8x256xf32>
    %17 = tpu.matmul %16, %15, %cst_14 {dimension_numbers = #tpu.dot_dimension_numbers<[1], [1], [0], [0], [0, 0, 1, 0], [], []>} : vector<8x128xf32>, vector<256x128xf32>, vector<8x256xf32> -> vector<8x256xf32>
    %18 = vector.extract_strided_slice %17 {offsets = [0, 0], sizes = [1, 256], strides = [1, 1]} : vector<8x256xf32> to vector<1x256xf32>
    %19 = vector.broadcast %3 : vector<1x1xf32> to vector<1x256xf32>
    %20 = arith.addf %18, %19 : vector<1x256xf32>
    %c0_15 = arith.constant 0 : index
    %c0_16 = arith.constant 0 : index
    %21 = vector.load %arg6[%c0_15, %c0_16] : memref<1x256xf32, #tpu.memory_space<vmem>>, vector<1x256xf32>
    tpu.vector_store %arg6[%c0_15, %c0_16], %20 {strides = array<i32>} : memref<1x256xf32, #tpu.memory_space<vmem>>, vector<1x256xf32>,
    return
  }
  func.func @transform_0(%arg0: i32) -> (i32, i32) {
    %c0_i32 = arith.constant 0 : i32
    %c0_i32_0 = arith.constant 0 : i32
    return %arg0, %c0_i32 : i32, i32
  }
  func.func @transform_1(%arg0: i32) -> (i32, i32) {
    %c0_i32 = arith.constant 0 : i32
    %c0_i32_0 = arith.constant 0 : i32
    %c0_i32_1 = arith.constant 0 : i32
    return %c0_i32, %c0_i32_0 : i32, i32
  }
  func.func @transform_2(%arg0: i32) -> (i32, i32) {
    %c0_i32 = arith.constant 0 : i32
    %c0_i32_0 = arith.constant 0 : i32
    %c0_i32_1 = arith.constant 0 : i32
    return %c0_i32, %c0_i32_0 : i32, i32
  }
  func.func @transform_3(%arg0: i32) -> (i32, i32) {
    %c0_i32 = arith.constant 0 : i32
    %c0_i32_0 = arith.constant 0 : i32
    %c0_i32_1 = arith.constant 0 : i32
    return %c0_i32, %c0_i32_0 : i32, i32
  }
  func.func @transform_4(%arg0: i32) -> (i32, i32) {
    %c0_i32 = arith.constant 0 : i32
    %c0_i32_0 = arith.constant 0 : i32
    %c0_i32_1 = arith.constant 0 : i32
    return %c0_i32, %c0_i32_0 : i32, i32
  }
  func.func @transform_5(%arg0: i32) -> (i32, i32) {
    %c0_i32 = arith.constant 0 : i32
    %c0_i32_0 = arith.constant 0 : i32
    return %c0_i32, %arg0 : i32, i32
  }
}

module attributes {stable_mosaic.version = 11 : i64} {
  func.func @kernel(%arg0: i32, %arg1: memref<256x32xf32, #tpu.memory_space<vmem>>, %arg2: memref<32x128xf32, #tpu.memory_space<vmem>>, %arg3: memref<128x128xf32, #tpu.memory_space<vmem>>, %arg4: memref<8x128xf32, #tpu.memory_space<vmem>>, %arg5: memref<3x128xf32, #tpu.memory_space<vmem>>, %arg6: memref<1x256xf32, #tpu.memory_space<vmem>>) attributes {dimension_semantics = [#tpu.dimension_semantics<parallel>], iteration_bounds = array<i64: 1>, scalar_prefetch = 0 : i64, scratch_operands = 0 : i64, tpu.core_type = #tpu.core_type<tc>, window_params = [{transform_indices = @transform_0, window_bounds = array<i64: 256, 32>}, {pipeline_mode = #tpu.pipeline_mode<synchronous>, transform_indices = @transform_1, window_bounds = array<i64: 32, 128>}, {pipeline_mode = #tpu.pipeline_mode<synchronous>, transform_indices = @transform_2, window_bounds = array<i64: 128, 128>}, {pipeline_mode = #tpu.pipeline_mode<synchronous>, transform_indices = @transform_3, window_bounds = array<i64: 8, 128>}, {pipeline_mode = #tpu.pipeline_mode<synchronous>, transform_indices = @transform_4, window_bounds = array<i64: 3, 128>}, {transform_indices = @transform_5, window_bounds = array<i64: 1, 256>}]} {
    %c0 = arith.constant 0 : index
    %c0_0 = arith.constant 0 : index
    %0 = vector.load %arg1[%c0, %c0_0] : memref<256x32xf32, #tpu.memory_space<vmem>>, vector<256x32xf32>
    %c0_1 = arith.constant 0 : index
    %c0_2 = arith.constant 0 : index
    %1 = vector.load %arg5[%c0_1, %c0_2] : memref<3x128xf32, #tpu.memory_space<vmem>>, vector<1x128xf32>
    %c1 = arith.constant 1 : index
    %c0_3 = arith.constant 0 : index
    %2 = vector.load %arg5[%c1, %c0_3] : memref<3x128xf32, #tpu.memory_space<vmem>>, vector<1x128xf32>
    %c2 = arith.constant 2 : index
    %c0_4 = arith.constant 0 : index
    %3 = vector.load %arg5[%c2, %c0_4] : memref<3x128xf32, #tpu.memory_space<vmem>>, vector<1x1xf32>
    %c0_5 = arith.constant 0 : index
    %c0_6 = arith.constant 0 : index
    %4 = vector.load %arg2[%c0_5, %c0_6] : memref<32x128xf32, #tpu.memory_space<vmem>>, vector<32x128xf32>
    %cst = arith.constant dense<0.000000e+00> : vector<256x128xf32>
    %5 = tpu.matmul %0, %4, %cst {dimension_numbers = #tpu.dot_dimension_numbers<[1], [0], [0], [1], [0, 0, 1, 1], [], []>} : vector<256x32xf32>, vector<32x128xf32>, vector<256x128xf32> -> vector<256x128xf32>
    %6 = vector.broadcast %1 : vector<1x128xf32> to vector<256x128xf32>
    %7 = arith.addf %5, %6 : vector<256x128xf32>
    %cst_7 = arith.constant 0.000000e+00 : f32
    %8 = vector.broadcast %cst_7 : f32 to vector<256x128xf32>
    %9 = arith.maximumf %7, %8 : vector<256x128xf32>
    %c0_8 = arith.constant 0 : index
    %c0_9 = arith.constant 0 : index
    %10 = vector.load %arg3[%c0_8, %c0_9] : memref<128x128xf32, #tpu.memory_space<vmem>>, vector<128x128xf32>
    %cst_10 = arith.constant dense<0.000000e+00> : vector<256x128xf32>
    %11 = tpu.matmul %9, %10, %cst_10 {dimension_numbers = #tpu.dot_dimension_numbers<[1], [0], [0], [1], [0, 0, 1, 1], [], []>} : vector<256x128xf32>, vector<128x128xf32>, vector<256x128xf32> -> vector<256x128xf32>
    %12 = vector.broadcast %2 : vector<1x128xf32> to vector<256x128xf32>
    %13 = arith.addf %11, %12 : vector<256x128xf32>
    %cst_11 = arith.constant 0.000000e+00 : f32
    %14 = vector.broadcast %cst_11 : f32 to vector<256x128xf32>
    %15 = arith.maximumf %13, %14 : vector<256x128xf32>
    %c0_12 = arith.constant 0 : index
    %c0_13 = arith.constant 0 : index
    %16 = vector.load %arg4[%c0_12, %c0_13] : memref<8x128xf32, #tpu.memory_space<vmem>>, vector<8x128xf32>
    %cst_14 = arith.constant dense<0.000000e+00> : vector<8x256xf32>
    %17 = tpu.matmul %16, %15, %cst_14 {dimension_numbers = #tpu.dot_dimension_numbers<[1], [1], [0], [0], [0, 0, 1, 0], [], []>} : vector<8x128xf32>, vector<256x128xf32>, vector<8x256xf32> -> vector<8x256xf32>
    %18 = vector.extract_strided_slice %17 {offsets = [0, 0], sizes = [1, 256], strides = [1, 1]} : vector<8x256xf32> to vector<1x256xf32>
    %19 = vector.broadcast %3 : vector<1x1xf32> to vector<1x256xf32>
    %20 = arith.addf %18, %19 : vector<1x256xf32>
    %c0_15 = arith.constant 0 : index
    %c0_16 = arith.constant 0 : index
    %21 = vector.load %arg6[%c0_15, %c0_16] : memref<1x256xf32, #tpu.memory_space<vmem>>, vector<1x256xf32>
    tpu.vector_store %arg6[%c0_15, %c0_16], %20 {strides = array<i32>} : memref<1x256xf32, #tpu.memory_space<vmem>>, vector<1x256xf32>,
    return
  }
  func.func @transform_0(%arg0: i32) -> (i32, i32) {
    %c0_i32 = arith.constant 0 : i32
    %c0_i32_0 = arith.constant 0 : i32
    return %arg0, %c0_i32 : i32, i32
  }
  func.func @transform_1(%arg0: i32) -> (i32, i32) {
    %c0_i32 = arith.constant 0 : i32
    %c0_i32_0 = arith.constant 0 : i32
    %c0_i32_1 = arith.constant 0 : i32
    return %c0_i32, %c0_i32_0 : i32, i32
  }
  func.func @transform_2(%arg0: i32) -> (i32, i32) {
    %c0_i32 = arith.constant 0 : i32
    %c0_i32_0 = arith.constant 0 : i32
    %c0_i32_1 = arith.constant 0 : i32
    return %c0_i32, %c0_i32_0 : i32, i32
  }
  func.func @transform_3(%arg0: i32) -> (i32, i32) {
    %c0_i32 = arith.constant 0 : i32
    %c0_i32_0 = arith.constant 0 : i32
    %c0_i32_1 = arith.constant 0 : i32
    return %c0_i32, %c0_i32_0 : i32, i32
  }
  func.func @transform_4(%arg0: i32) -> (i32, i32) {
    %c0_i32 = arith.constant 0 : i32
    %c0_i32_0 = arith.constant 0 : i32
    %c0_i32_1 = arith.constant 0 : i32
    return %c0_i32, %c0_i32_0 : i32, i32
  }
  func.func @transform_5(%arg0: i32) -> (i32, i32) {
    %c0_i32 = arith.constant 0 : i32
    %c0_i32_0 = arith.constant 0 : i32
    return %c0_i32, %arg0 : i32, i32
  }
}

</mosaic_0001>

<bundles_post_ra>
// kernel: tpu_custom_call.1
= control target key start
LH: loop header
LB: loop body
LE: loop exit
PB: predicated region body
PF: predicated region fallthrough
CT: control target
= control target key end

     0   :  { %10 = vsyncpa [#allocation3], 0  ;;  %s1557_s0 = inlined_call_operand.hbm [shape: f32[16,32], index: 0, kind: input, shape index: {}]   ;;  %s1558_s1 = inlined_call_operand.hbm [shape: f32[32,128], index: 1, kind: input, shape index: {}]   ;;  %s1559_s2 = inlined_call_operand.hbm [shape: f32[128,128], index: 2, kind: input, shape index: {}]   ;;  %s1560_s3 = inlined_call_operand.vmem [shape: f32[8,128], index: 3, kind: input, shape index: {}]   ;;  %s1561_s4 = inlined_call_operand.vmem [shape: f32[3,128], index: 4, kind: input, shape index: {}]   ;;  %s1562_s5 = inlined_call_operand.hbm [shape: f32[1,16], index: 5, kind: output, shape index: {}]  }
   0x1   :  { %11 = vsyncpa [#allocation6], 0 }
   0x2   :  { %12 = vsyncpa [#allocation4], 0 }
   0x3   :  { %17 = vsyncadd [#allocation3], 3840  ;;  %s1317_s18 = smov [#allocation5]   ;;  %s1318_s20 = smov [#allocation2]  }
   0x4   :  { %s30_s19 = sshll.u32 %s1317_s18, 4  ;;  %s18_s21 = sshll.u32 %s1318_s20, 4  ;;  %s31_s19 = int_to_ptr.vmem [resolvable:$true] %s30_s19  ;;  %s1355_s21 = int_to_ptr.vmem [resolvable:$true] %s18_s21 }
   0x5   :  { %s1223_s24 = scalar_lea.hbm %s1558_s1, 512 }
   0x6   :  { %p1224_p0 = scmp.ne.s32.totalorder %s1558_s1, %s1223_s24  ;;  %p1227_p1 = scmp.lt.u32.totalorder %s1223_s24, %s1558_s1 }
   0x8   :  { %p1229_p2 = pnand %p1227_p1, %p1224_p0 }
   0xa   :  { %1232 = shalt.err (!%p1229_p2)
}
   0xb   :  { %s1233_s29 = scalar_lea.vmem %s31_s19, 512  ;;  %p1238_p4 = scmp.lt.s32.totalorder %s31_s19, %s31_s19 }
   0xc   :  { %p1234_p3 = scmp.ne.s32.totalorder %s31_s19, %s1233_s29  ;;  %p1239_p5 = scmp.lt.s32.totalorder %s1233_s29, %s1233_s29 }
   0xe   :  { %p1240_p6 = por %p1239_p5, %p1238_p4 }
  0x10   :  { %p1241_p7 = pnand %p1240_p6, %p1234_p3 }
  0x12   :  { %1244 = shalt.err (!%p1241_p7)
}
  0x13   :  { %s1319_s30 = smov 128   ;;  %s1320_s6 = smov 8  }
  0x14   :  { %36 = dma.hbm_to_vmem [thread:$0]  %s1558_s1, 512, %s31_s19, [#allocation6], %s1319_s30, %s1319_s30, %s1320_s6  }
  0x15   :  { %s1245_s11 = scalar_lea.hbm %s1557_s0, 256 }
  0x16   :  { %p1246_p8 = scmp.ne.s32.totalorder %s1557_s0, %s1245_s11  ;;  %p1249_p9 = scmp.lt.u32.totalorder %s1245_s11, %s1557_s0 }
  0x18   :  { %p1251_p10 = pnand %p1249_p9, %p1246_p8 }
  0x1a   :  { %1254 = shalt.err (!%p1251_p10)
}
  0x1b   :  { %s1255_s16 = scalar_lea.vmem %s1355_s21, 256  ;;  %s1259_s1 = scalar_lea.vmem %s1355_s21, 4096 }
  0x1c   :  { %p1256_p11 = scmp.ne.s32.totalorder %s1355_s21, %s1255_s16  ;;  %p1260_p12 = scmp.lt.s32.totalorder %s1355_s21, %s1355_s21 }
  0x1d   :  { %p1261_p13 = scmp.lt.s32.totalorder %s1259_s1, %s1255_s16 }
  0x1f   :  { %p1262_p0 = por %p1261_p13, %p1260_p12 }
  0x21   :  { %p1263_p1 = pnand %p1262_p0, %p1256_p11 }
  0x23   :  { %1266 = shalt.err (!%p1263_p1)
}
  0x24   :  { %24 = dma.hbm_to_vmem [thread:$0]  %s1557_s0, 256, %s1355_s21, [#allocation3], %s1319_s30, %s1319_s30, %s1320_s6  }
  0x25   :  { %s1321_s19 = smov [#allocation7]   ;;  %s1267_s24 = scalar_lea.hbm %s1559_s2, 2048 }
  0x26   :  { %s42_s20 = sshll.u32 %s1321_s19, 4  ;;  %p1268_p2 = scmp.ne.s32.totalorder %s1559_s2, %s1267_s24  ;;  %s43_s20 = int_to_ptr.vmem [resolvable:$true] %s42_s20 }
  0x27   :  { %p1271_p3 = scmp.lt.u32.totalorder %s1267_s24, %s1559_s2 }
  0x29   :  { %p1273_p4 = pnand %p1271_p3, %p1268_p2 }
  0x2b   :  { %1276 = shalt.err (!%p1273_p4)
}
  0x2c   :  { %s1277_s29 = scalar_lea.vmem %s43_s20, 2048  ;;  %p1282_p6 = scmp.lt.s32.totalorder %s43_s20, %s43_s20 }
  0x2d   :  { %p1278_p5 = scmp.ne.s32.totalorder %s43_s20, %s1277_s29  ;;  %p1283_p7 = scmp.lt.s32.totalorder %s1277_s29, %s1277_s29 }
  0x2f   :  { %p1284_p8 = por %p1283_p7, %p1282_p6 }
  0x31   :  { %p1285_p9 = pnand %p1284_p8, %p1278_p5 }
  0x33   :  { %1288 = shalt.err (!%p1285_p9)
}
  0x34   :  { %48 = dma.hbm_to_vmem [thread:$0]  %s1559_s2, 2048, %s43_s20, [#allocation6], %s1319_s30, %s1319_s30, %s1320_s6  }
  0x35   :  { %1311 = dma.done.wait [#allocation3], 4096  }
  0x36   :  { %1312 = vsyncadd [#allocation3], 4294963200 }
  0x37   :  { %1313 = dma.done.wait [#allocation6], 2560  }
  0x38   :  { %1314 = vsyncadd [#allocation6], 4294964736  ;;  %vm105_vm0 = vcmask 261120   ;;  %v97_v0 = vld [vmem:[#allocation5] sm:$0xff]  ;;  %v98_v1 = vld [vmem:[#allocation5 + $0x8] sm:$0xff] }
  0x39   :  { %v99_v2 = vld [vmem:[#allocation5 + $0x10] sm:$0xff]  ;;  %v1142_v3 = vpack.c.bf16 %v98_v1, %v97_v0  ;;  %v100_v4 = vld [vmem:[#allocation5 + $0x18] sm:$0xff]  ;;  %v62_v5 = vld [vmem:[#allocation2] sm:$0xff] }
  0x3a   :  { %v1146_v6 = vpack.c.bf16 %v100_v4, %v99_v2  ;;  %1014 = vmatprep.mubr.msk.f32.mxu0 %vm105_vm0, %v62_v5  ;;  %v63_v7 = vld [vmem:[#allocation2 + $0x8] sm:$0xff]  ;;  %v64_v8 = vld [vmem:[#allocation2 + $0x10] sm:$0xff]  ;;  %v65_v9 = vld [vmem:[#allocation2 + $0x18] sm:$0xff] }
  0x3b   :  { %1143 = vmatprep.subr.bf16.mxu0 %v1142_v3  ;;  %v459_v10 = vld [vmem:[#allocation7] sm:$0xff]  ;;  %v460_v11 = vld [vmem:[#allocation7 + $0x8] sm:$0xff]  ;;  %v461_v12 = vld [vmem:[#allocation7 + $0x10] sm:$0xff] }
  0x3c   :  { %1145 = vmatpush3.bf16.msra.mxu0 %v1142_v3  ;;  %v66_v13 = vld [vmem:[#allocation2 + $0x20] sm:$0xff]  ;;  %v1150_v14 = vpack.c.bf16 %v460_v11, %v459_v10  ;;  %v462_v15 = vld [vmem:[#allocation7 + $0x18] sm:$0xff]  ;;  %v464_v18 = vld [vmem:[#allocation7 + $0x28] sm:$0xff] }
  0x3d   :  { %1147 = vmatprep.subr.bf16.mxu0 %v1146_v6  ;;  %v1154_v16 = vpack.c.bf16 %v462_v15, %v461_v12  ;;  %v463_v17 = vld [vmem:[#allocation7 + $0x20] sm:$0xff]  ;;  %v67_v19 = vld [vmem:[#allocation2 + $0x28] sm:$0xff]  ;;  %v68_v20 = vld [vmem:[#allocation2 + $0x30] sm:$0xff] }
  0x3e   :  { %1151 = vmatprep.subr.bf16.mxu1 %v1150_v14  ;;  %v1158_v21 = vpack.c.bf16 %v464_v18, %v463_v17  ;;  %v465_v22 = vld [vmem:[#allocation7 + $0x30] sm:$0xff]  ;;  %v466_v23 = vld [vmem:[#allocation7 + $0x38] sm:$0xff]  ;;  %v70_v25 = vld [vmem:[#allocation2 + $0x40] sm:$0xff] }
  0x3f   :  { %1153 = vmatpush3.bf16.msra.mxu1 %v1150_v14  ;;  %v69_v24 = vld [vmem:[#allocation2 + $0x38] sm:$0xff]  ;;  %v1162_v26 = vpack.c.bf16 %v466_v23, %v465_v22  ;;  %v467_v27 = vld [vmem:[#allocation7 + $0x40] sm:$0xff]  ;;  %v468_v28 = vld [vmem:[#allocation7 + $0x48] sm:$0xff] }
  0x40   :  { %1149 = vmatpush3.bf16.msra.mxu0 %v1146_v6  ;;  %1155 = vmatprep.subr.bf16.mxu1 %v1154_v16  ;;  %v71_v29 = vld [vmem:[#allocation2 + $0x48] sm:$0xff]  ;;  %v72_v30 = vld [vmem:[#allocation2 + $0x50] sm:$0xff]  ;;  %v1166_v31 = vpack.c.bf16 %v468_v28, %v467_v27  ;;  %v470_v33 = vld [vmem:[#allocation7 + $0x58] sm:$0xff] }
  0x41   :  { %v469_v32 = vld [vmem:[#allocation7 + $0x50] sm:$0xff]  ;;  %v73_v34 = vld [vmem:[#allocation2 + $0x58] sm:$0xff]  ;;  %v74_v35 = vld [vmem:[#allocation2 + $0x60] sm:$0xff] }
  0x42   :  { %v1170_v36 = vpack.c.bf16 %v470_v33, %v469_v32  ;;  %v471_v37 = vld [vmem:[#allocation7 + $0x60] sm:$0xff]  ;;  %v472_v38 = vld [vmem:[#allocation7 + $0x68] sm:$0xff]  ;;  %v76_v40 = vld [vmem:[#allocation2 + $0x70] sm:$0xff] }
  0x43   :  { %1015 = vmatmul.mubr.msk.f32.vlgmr.msra.gmra.mrb[0].mxu0 %vm105_vm0, %v63_v7  ;;  %1157 = vmatpush3.bf16.msra.mxu1 %v1154_v16  ;;  %v75_v39 = vld [vmem:[#allocation2 + $0x68] sm:$0xff]  ;;  %v1174_v41 = vpack.c.bf16 %v472_v38, %v471_v37  ;;  %v77_v42 = vld [vmem:[#allocation2 + $0x78] sm:$0xff]  ;;  %v78_v43 = vld [vmem:[#allocation2 + $0x80] sm:$0xff] }
  0x44   :  { %1017 = vmatprep.mubr.msk.f32.mxu0 %vm105_vm0, %v64_v8  ;;  %1159 = vmatprep.subr.bf16.mxu1 %v1158_v21  ;;  %v79_v44 = vld [vmem:[#allocation2 + $0x88] sm:$0xff]  ;;  %v80_v45 = vld [vmem:[#allocation2 + $0x90] sm:$0xff]  ;;  %v81_v46 = vld [vmem:[#allocation2 + $0x98] sm:$0xff] }
  0x45   :  { %v82_v47 = vld [vmem:[#allocation2 + $0xa0] sm:$0xff]  ;;  %v83_v48 = vld [vmem:[#allocation2 + $0xa8] sm:$0xff]  ;;  %v84_v49 = vld [vmem:[#allocation2 + $0xb0] sm:$0xff] }
  0x46   :  { %v85_v50 = vld [vmem:[#allocation2 + $0xb8] sm:$0xff]  ;;  %v86_v51 = vld [vmem:[#allocation2 + $0xc0] sm:$0xff]  ;;  %v87_v52 = vld [vmem:[#allocation2 + $0xc8] sm:$0xff] }
  0x47   :  { %1018 = vmatmul.mubr.msk.f32.gmra.mrb[2].mxu0 %vm105_vm0, %v65_v9  ;;  %1161 = vmatpush3.bf16.msra.mxu1 %v1158_v21  ;;  %v88_v53 = vld [vmem:[#allocation2 + $0xd0] sm:$0xff]  ;;  %v89_v54 = vld [vmem:[#allocation2 + $0xd8] sm:$0xff]  ;;  %v90_v55 = vld [vmem:[#allocation2 + $0xe0] sm:$0xff] }
  0x48   :  { %1020 = vmatprep.mubr.msk.f32.mxu0 %vm105_vm0, %v66_v13  ;;  %1163 = vmatprep.subr.bf16.mxu1 %v1162_v26  ;;  %v91_v56 = vld [vmem:[#allocation2 + $0xe8] sm:$0xff]  ;;  %v92_v57 = vld [vmem:[#allocation2 + $0xf0] sm:$0xff]  ;;  %v93_v58 = vld [vmem:[#allocation2 + $0xf8] sm:$0xff] }
  0x49   :  { %v473_v59 = vld [vmem:[#allocation7 + $0x70] sm:$0xff]  ;;  %v474_v60 = vld [vmem:[#allocation7 + $0x78] sm:$0xff]  ;;  %v1443_v62 = vld [vmem:[%s1561_s4] ss:$0 sm:$0xff] }
  0x4a   :  { %v1178_v61 = vpack.c.bf16 %v474_v60, %v473_v59 }
  0x4b   :  { %1021 = vmatmul.mubr.msk.f32.gmra.mrb[4].mxu0 %vm105_vm0, %v67_v19  ;;  %1165 = vmatpush3.bf16.msra.mxu1 %v1162_v26 }
  0x4c   :  { %1023 = vmatprep.mubr.msk.f32.mxu0 %vm105_vm0, %v68_v20  ;;  %1167 = vmatprep.subr.bf16.mxu1 %v1166_v31 }
  0x4f   :  { %1024 = vmatmul.mubr.msk.f32.gmra.mrb[6].mxu0 %vm105_vm0, %v69_v24  ;;  %1169 = vmatpush3.bf16.msra.mxu1 %v1166_v31 }
  0x50   :  { %1026 = vmatprep.mubr.msk.f32.mxu0 %vm105_vm0, %v70_v25  ;;  %1171 = vmatprep.subr.bf16.mxu1 %v1170_v36 }
  0x53   :  { %1027 = vmatmul.mubr.msk.f32.gmra.mrb[8].mxu0 %vm105_vm0, %v71_v29  ;;  %1173 = vmatpush3.bf16.msra.mxu1 %v1170_v36 }
  0x54   :  { %1029 = vmatprep.mubr.msk.f32.mxu0 %vm105_vm0, %v72_v30  ;;  %1175 = vmatprep.subr.bf16.mxu1 %v1174_v41 }
  0x57   :  { %1030 = vmatmul.mubr.msk.f32.gmra.mrb[10].mxu0 %vm105_vm0, %v73_v34  ;;  %1177 = vmatpush3.bf16.msra.mxu1 %v1174_v41 }
  0x58   :  { %1032 = vmatprep.mubr.msk.f32.mxu0 %vm105_vm0, %v74_v35  ;;  %1179 = vmatprep.subr.bf16.mxu1 %v1178_v61 }
  0x5b   :  { %1033 = vmatmul.mubr.msk.f32.gmra.mrb[12].mxu0 %vm105_vm0, %v75_v39  ;;  %1181 = vmatpush3.bf16.msra.mxu1 %v1178_v61 }
  0x5c   :  { %1035 = vmatprep.mubr.msk.f32.mxu0 %vm105_vm0, %v76_v40 }
  0x5f   :  { %1036 = vmatmul.mubr.msk.f32.gmra.mrb[14].mxu0 %vm105_vm0, %v77_v42 }
  0x60   :  { %1038 = vmatprep.mubr.msk.f32.mxu0 %vm105_vm0, %v78_v43 }
  0x63   :  { %1039 = vmatmul.mubr.msk.f32.gmra.mrb[16].mxu0 %vm105_vm0, %v79_v44 }
  0x64   :  { %1041 = vmatprep.mubr.msk.f32.mxu0 %vm105_vm0, %v80_v45 }
  0x67   :  { %1042 = vmatmul.mubr.msk.f32.gmra.mrb[18].mxu0 %vm105_vm0, %v81_v46 }
  0x68   :  { %1044 = vmatprep.mubr.msk.f32.mxu0 %vm105_vm0, %v82_v47 }
  0x6b   :  { %1045 = vmatmul.mubr.msk.f32.gmra.mrb[20].mxu0 %vm105_vm0, %v83_v48 }
  0x6c   :  { %1047 = vmatprep.mubr.msk.f32.mxu0 %vm105_vm0, %v84_v49 }
  0x6f   :  { %1048 = vmatmul.mubr.msk.f32.gmra.mrb[22].mxu0 %vm105_vm0, %v85_v50 }
  0x70   :  { %1050 = vmatprep.mubr.msk.f32.mxu0 %vm105_vm0, %v86_v51 }
  0x73   :  { %1051 = vmatmul.mubr.msk.f32.gmra.mrb[24].mxu0 %vm105_vm0, %v87_v52 }
  0x74   :  { %1053 = vmatprep.mubr.msk.f32.mxu0 %vm105_vm0, %v88_v53 }
  0x77   :  { %1054 = vmatmul.mubr.msk.f32.gmra.mrb[26].mxu0 %vm105_vm0, %v89_v54 }
  0x78   :  { %1056 = vmatprep.mubr.msk.f32.mxu0 %vm105_vm0, %v90_v55 }
  0x7b   :  { %1057 = vmatmul.mubr.msk.f32.gmra.mrb[28].mxu0 %vm105_vm0, %v91_v56 }
  0x7c   :  { %1059 = vmatprep.mubr.msk.f32.mxu0 %vm105_vm0, %v92_v57 }
  0x7f   :  { %1060 = vmatmul.mubr.msk.f32.gmra.mrb[30].mxu0 %vm105_vm0, %v93_v58 }
 0x116   :  { %v1016_v63 = vpop.f32.mrb[0].mxu0 }
 0x117   :  { %v274_v0 = vadd.f32 %v1016_v63, %v1443_v62  ;;  %v268_v1 = vpop.f32.mrb[1].mxu0 }
 0x118   :  { %v269_v2 = vadd.f32 %v1443_v62, %v268_v1 }
 0x119   :  { %v428_v5 = vmax.f32 %v274_v0, 0.0 }
 0x11a   :  { %v1019_v3 = vpop.f32.mrb[2].mxu0  ;;  %v427_v4 = vmax.f32 %v269_v2, 0.0 }
 0x11b   :  { %v284_v6 = vadd.f32 %v1019_v3, %v1443_v62  ;;  %v278_v7 = vpop.f32.mrb[3].mxu0 }
 0x11c   :  { %v279_v8 = vadd.f32 %v1443_v62, %v278_v7  ;;  %1094 = vmatprep.mubr.f32.mxu1 %v427_v4 }
 0x11d   :  { %1095 = vmatmul.mubr.f32.vlgmr.msra.gmra.mrb[0].mxu1 %v428_v5  ;;  %v430_v11 = vmax.f32 %v284_v6, 0.0 }
 0x11e   :  { %v429_v9 = vmax.f32 %v279_v8, 0.0  ;;  %v1022_v10 = vpop.f32.mrb[4].mxu0 }
 0x11f   :  { %v294_v12 = vadd.f32 %v1022_v10, %v1443_v62  ;;  %v288_v13 = vpop.f32.mrb[5].mxu0 }
 0x120   :  { %v289_v14 = vadd.f32 %v1443_v62, %v288_v13  ;;  %1097 = vmatprep.mubr.f32.mxu1 %v429_v9 }
 0x121   :  { %1098 = vmatmul.mubr.f32.gmra.mrb[2].mxu1 %v430_v11  ;;  %v432_v17 = vmax.f32 %v294_v12, 0.0 }
 0x122   :  { %v431_v15 = vmax.f32 %v289_v14, 0.0  ;;  %v1025_v16 = vpop.f32.mrb[6].mxu0 }
 0x123   :  { %v304_v18 = vadd.f32 %v1025_v16, %v1443_v62  ;;  %v298_v19 = vpop.f32.mrb[7].mxu0 }
 0x124   :  { %v299_v20 = vadd.f32 %v1443_v62, %v298_v19  ;;  %1100 = vmatprep.mubr.f32.mxu1 %v431_v15 }
 0x125   :  { %1101 = vmatmul.mubr.f32.gmra.mrb[4].mxu1 %v432_v17  ;;  %v434_v23 = vmax.f32 %v304_v18, 0.0 }
 0x126   :  { %v433_v21 = vmax.f32 %v299_v20, 0.0  ;;  %v1028_v22 = vpop.f32.mrb[8].mxu0 }
 0x127   :  { %v314_v24 = vadd.f32 %v1028_v22, %v1443_v62  ;;  %v308_v25 = vpop.f32.mrb[9].mxu0 }
 0x128   :  { %v309_v26 = vadd.f32 %v1443_v62, %v308_v25  ;;  %1103 = vmatprep.mubr.f32.mxu1 %v433_v21 }
 0x129   :  { %1104 = vmatmul.mubr.f32.gmra.mrb[6].mxu1 %v434_v23  ;;  %v436_v29 = vmax.f32 %v314_v24, 0.0 }
 0x12a   :  { %v435_v27 = vmax.f32 %v309_v26, 0.0  ;;  %v1031_v28 = vpop.f32.mrb[10].mxu0 }
 0x12b   :  { %v324_v30 = vadd.f32 %v1031_v28, %v1443_v62  ;;  %v318_v31 = vpop.f32.mrb[11].mxu0 }
 0x12c   :  { %v319_v32 = vadd.f32 %v1443_v62, %v318_v31  ;;  %1106 = vmatprep.mubr.f32.mxu1 %v435_v27 }
 0x12d   :  { %1107 = vmatmul.mubr.f32.gmra.mrb[8].mxu1 %v436_v29  ;;  %v438_v35 = vmax.f32 %v324_v30, 0.0 }
 0x12e   :  { %v437_v33 = vmax.f32 %v319_v32, 0.0  ;;  %v1034_v34 = vpop.f32.mrb[12].mxu0  ;;  %v1480_v32 = vld [vmem:[%s1560_s3] sm:$0xff] }
 0x12f   :  { %v334_v36 = vadd.f32 %v1034_v34, %v1443_v62  ;;  %v328_v37 = vpop.f32.mrb[13].mxu0  ;;  %1004 = vmatprep.mubr.f32.mxu0 %v1480_v32  ;;  %v1322_v34 = vmov 0  }
 0x130   :  { %v329_v38 = vadd.f32 %v1443_v62, %v328_v37  ;;  %1109 = vmatprep.mubr.f32.mxu1 %v437_v33  ;;  %v96_v33 = vld [vmem:[%s1561_s4 + $0x2] sm:$0x1]  ;;  %1222 = vset.pattern.permute.xlu0 %v1322_v34 }
 0x131   :  { %1110 = vmatmul.mubr.f32.gmra.mrb[10].mxu1 %v438_v35  ;;  %v440_v41 = vmax.f32 %v334_v36, 0.0  ;;  %810 = vperm.xlu0 %1222, %v96_v33  }
 0x132   :  { %v439_v39 = vmax.f32 %v329_v38, 0.0  ;;  %v1037_v40 = vpop.f32.mrb[14].mxu0 }
 0x133   :  { %v344_v42 = vadd.f32 %v1037_v40, %v1443_v62  ;;  %v338_v43 = vpop.f32.mrb[15].mxu0 }
 0x134   :  { %v339_v44 = vadd.f32 %v1443_v62, %v338_v43  ;;  %1112 = vmatprep.mubr.f32.mxu1 %v439_v39 }
 0x135   :  { %1113 = vmatmul.mubr.f32.gmra.mrb[12].mxu1 %v440_v41  ;;  %v442_v47 = vmax.f32 %v344_v42, 0.0 }
 0x136   :  { %v441_v45 = vmax.f32 %v339_v44, 0.0  ;;  %v1040_v46 = vpop.f32.mrb[16].mxu0 }
 0x137   :  { %v354_v48 = vadd.f32 %v1040_v46, %v1443_v62  ;;  %v348_v49 = vpop.f32.mrb[17].mxu0 }
 0x138   :  { %v349_v50 = vadd.f32 %v1443_v62, %v348_v49  ;;  %1115 = vmatprep.mubr.f32.mxu1 %v441_v45 }
 0x139   :  { %1116 = vmatmul.mubr.f32.gmra.mrb[14].mxu1 %v442_v47  ;;  %v444_v53 = vmax.f32 %v354_v48, 0.0 }
 0x13a   :  { %v443_v51 = vmax.f32 %v349_v50, 0.0  ;;  %v1043_v52 = vpop.f32.mrb[18].mxu0 }
 0x13b   :  { %v364_v54 = vadd.f32 %v1043_v52, %v1443_v62  ;;  %v358_v55 = vpop.f32.mrb[19].mxu0 }
 0x13c   :  { %v359_v56 = vadd.f32 %v1443_v62, %v358_v55  ;;  %1118 = vmatprep.mubr.f32.mxu1 %v443_v51 }
 0x13d   :  { %v446_v57 = vmax.f32 %v364_v54, 0.0  ;;  %1119 = vmatmul.mubr.f32.gmra.mrb[16].mxu1 %v444_v53 }
 0x13e   :  { %v445_v58 = vmax.f32 %v359_v56, 0.0  ;;  %v1046_v59 = vpop.f32.mrb[20].mxu0 }
 0x13f   :  { %v374_v60 = vadd.f32 %v1046_v59, %v1443_v62  ;;  %v368_v61 = vpop.f32.mrb[21].mxu0 }
 0x140   :  { %1121 = vmatprep.mubr.f32.mxu1 %v445_v58  ;;  %v369_v63 = vadd.f32 %v1443_v62, %v368_v61 }
 0x141   :  { %1122 = vmatmul.mubr.f32.gmra.mrb[18].mxu1 %v446_v57  ;;  %v448_v0 = vmax.f32 %v374_v60, 0.0 }
 0x142   :  { %v447_v1 = vmax.f32 %v369_v63, 0.0  ;;  %v1049_v2 = vpop.f32.mrb[22].mxu0 }
 0x143   :  { %v384_v3 = vadd.f32 %v1049_v2, %v1443_v62  ;;  %v378_v4 = vpop.f32.mrb[23].mxu0 }
 0x144   :  { %1124 = vmatprep.mubr.f32.mxu1 %v447_v1  ;;  %v379_v5 = vadd.f32 %v1443_v62, %v378_v4 }
 0x145   :  { %1125 = vmatmul.mubr.f32.gmra.mrb[20].mxu1 %v448_v0  ;;  %v450_v6 = vmax.f32 %v384_v3, 0.0 }
 0x146   :  { %v449_v7 = vmax.f32 %v379_v5, 0.0  ;;  %v1052_v8 = vpop.f32.mrb[24].mxu0 }
 0x147   :  { %v394_v9 = vadd.f32 %v1052_v8, %v1443_v62  ;;  %v388_v10 = vpop.f32.mrb[25].mxu0 }
 0x148   :  { %1127 = vmatprep.mubr.f32.mxu1 %v449_v7  ;;  %v389_v11 = vadd.f32 %v1443_v62, %v388_v10 }
 0x149   :  { %1128 = vmatmul.mubr.f32.gmra.mrb[22].mxu1 %v450_v6  ;;  %v452_v12 = vmax.f32 %v394_v9, 0.0 }
 0x14a   :  { %v451_v13 = vmax.f32 %v389_v11, 0.0  ;;  %v1055_v14 = vpop.f32.mrb[26].mxu0 }
 0x14b   :  { %v404_v15 = vadd.f32 %v1055_v14, %v1443_v62  ;;  %v398_v16 = vpop.f32.mrb[27].mxu0 }
 0x14c   :  { %1130 = vmatprep.mubr.f32.mxu1 %v451_v13  ;;  %v399_v17 = vadd.f32 %v1443_v62, %v398_v16 }
 0x14d   :  { %1131 = vmatmul.mubr.f32.gmra.mrb[24].mxu1 %v452_v12  ;;  %v454_v18 = vmax.f32 %v404_v15, 0.0 }
 0x14e   :  { %v453_v19 = vmax.f32 %v399_v17, 0.0  ;;  %v1058_v20 = vpop.f32.mrb[28].mxu0 }
 0x14f   :  { %v414_v21 = vadd.f32 %v1058_v20, %v1443_v62  ;;  %v408_v22 = vpop.f32.mrb[29].mxu0 }
 0x150   :  { %1133 = vmatprep.mubr.f32.mxu1 %v453_v19  ;;  %v409_v23 = vadd.f32 %v1443_v62, %v408_v22 }
 0x151   :  { %1134 = vmatmul.mubr.f32.gmra.mrb[26].mxu1 %v454_v18  ;;  %v456_v24 = vmax.f32 %v414_v21, 0.0 }
 0x152   :  { %v455_v25 = vmax.f32 %v409_v23, 0.0  ;;  %v1061_v26 = vpop.f32.mrb[30].mxu0 }
 0x153   :  { %v424_v27 = vadd.f32 %v1061_v26, %v1443_v62  ;;  %v418_v28 = vpop.f32.mrb[31].mxu0 }
 0x154   :  { %1136 = vmatprep.mubr.f32.mxu1 %v455_v25  ;;  %v419_v29 = vadd.f32 %v1443_v62, %v418_v28  ;;  %v1489_v62 = vld [vmem:[%s1561_s4 + $0x1] ss:$0 sm:$0xff] }
 0x155   :  { %1137 = vmatmul.mubr.f32.gmra.mrb[28].mxu1 %v456_v24  ;;  %v458_v30 = vmax.f32 %v424_v27, 0.0 }
 0x156   :  { %v457_v31 = vmax.f32 %v419_v29, 0.0 }
 0x158   :  { %1139 = vmatprep.mubr.f32.mxu1 %v457_v31 }
 0x159   :  { %1140 = vmatmul.mubr.f32.gmra.mrb[30].mxu1 %v458_v30 }
 0x1f0   :  { %v1096_v35 = vpop.f32.mrb[0].mxu1 }
 0x1f1   :  { %v551_v36 = vadd.f32 %v1096_v35, %v1489_v62  ;;  %v545_v37 = vpop.f32.mrb[1].mxu1 }
 0x1f2   :  { %v546_v38 = vadd.f32 %v1489_v62, %v545_v37 }
 0x1f3   :  { %v705_v39 = vmax.f32 %v551_v36, 0.0 }
 0x1f4   :  { %v704_v40 = vmax.f32 %v546_v38, 0.0  ;;  %v1099_v41 = vpop.f32.mrb[2].mxu1 }
 0x1f5   :  { %v561_v42 = vadd.f32 %v1099_v41, %v1489_v62  ;;  %v555_v43 = vpop.f32.mrb[3].mxu1 }
 0x1f6   :  { %v1184_v44 = vpack.c.bf16 %v705_v39, %v704_v40  ;;  %v556_v45 = vadd.f32 %v1489_v62, %v555_v43 }
 0x1f7   :  { %v707_v46 = vmax.f32 %v561_v42, 0.0 }
 0x1f8   :  { %v706_v47 = vmax.f32 %v556_v45, 0.0  ;;  %v1102_v48 = vpop.f32.mrb[4].mxu1 }
 0x1f9   :  { %v571_v49 = vadd.f32 %v1102_v48, %v1489_v62  ;;  %v565_v50 = vpop.f32.mrb[5].mxu1 }
 0x1fa   :  { %v1496_v51 = vpack.c.bf16 %v707_v46, %v706_v47  ;;  %v566_v52 = vadd.f32 %v1489_v62, %v565_v50 }
 0x1fb   :  { %v709_v53 = vmax.f32 %v571_v49, 0.0 }
 0x1fc   :  { %v708_v54 = vmax.f32 %v566_v52, 0.0  ;;  %v1105_v55 = vpop.f32.mrb[6].mxu1 }
 0x1fd   :  { %v581_v56 = vadd.f32 %v1105_v55, %v1489_v62  ;;  %v575_v57 = vpop.f32.mrb[7].mxu1 }
 0x1fe   :  { %v1500_v58 = vpack.c.bf16 %v709_v53, %v708_v54  ;;  %v576_v59 = vadd.f32 %v1489_v62, %v575_v57 }
 0x1ff   :  { %v711_v60 = vmax.f32 %v581_v56, 0.0 }
 0x200   :  { %v710_v61 = vmax.f32 %v576_v59, 0.0  ;;  %v1108_v63 = vpop.f32.mrb[8].mxu1 }
 0x201   :  { %v591_v0 = vadd.f32 %v1108_v63, %v1489_v62  ;;  %v585_v1 = vpop.f32.mrb[9].mxu1 }
 0x202   :  { %v1504_v2 = vpack.c.bf16 %v711_v60, %v710_v61  ;;  %v586_v3 = vadd.f32 %v1489_v62, %v585_v1 }
 0x203   :  { %v713_v4 = vmax.f32 %v591_v0, 0.0 }
 0x204   :  { %v712_v5 = vmax.f32 %v586_v3, 0.0  ;;  %v1111_v6 = vpop.f32.mrb[10].mxu1 }
 0x205   :  { %v601_v7 = vadd.f32 %v1111_v6, %v1489_v62  ;;  %v595_v8 = vpop.f32.mrb[11].mxu1 }
 0x206   :  { %v1508_v9 = vpack.c.bf16 %v713_v4, %v712_v5  ;;  %v596_v10 = vadd.f32 %v1489_v62, %v595_v8 }
 0x207   :  { %v715_v11 = vmax.f32 %v601_v7, 0.0 }
 0x208   :  { %v714_v12 = vmax.f32 %v596_v10, 0.0  ;;  %v1114_v13 = vpop.f32.mrb[12].mxu1 }
 0x209   :  { %v611_v14 = vadd.f32 %v1114_v13, %v1489_v62  ;;  %v605_v15 = vpop.f32.mrb[13].mxu1 }
 0x20a   :  { %v1512_v16 = vpack.c.bf16 %v715_v11, %v714_v12  ;;  %v606_v17 = vadd.f32 %v1489_v62, %v605_v15 }
 0x20b   :  { %v717_v18 = vmax.f32 %v611_v14, 0.0 }
 0x20c   :  { %v716_v19 = vmax.f32 %v606_v17, 0.0  ;;  %v1117_v20 = vpop.f32.mrb[14].mxu1 }
 0x20d   :  { %v621_v21 = vadd.f32 %v1117_v20, %v1489_v62  ;;  %v615_v22 = vpop.f32.mrb[15].mxu1 }
 0x20e   :  { %v1516_v23 = vpack.c.bf16 %v717_v18, %v716_v19  ;;  %v616_v24 = vadd.f32 %v1489_v62, %v615_v22 }
 0x20f   :  { %v719_v25 = vmax.f32 %v621_v21, 0.0 }
 0x210   :  { %v718_v26 = vmax.f32 %v616_v24, 0.0  ;;  %v1120_v27 = vpop.f32.mrb[16].mxu1 }
 0x211   :  { %v631_v28 = vadd.f32 %v1120_v27, %v1489_v62  ;;  %v625_v29 = vpop.f32.mrb[17].mxu1  ;;  %v821_v27 = vlaneseq }
 0x212   :  { %v1520_v30 = vpack.c.bf16 %v719_v25, %v718_v26  ;;  %v626_v31 = vadd.f32 %v1489_v62, %v625_v29 }
 0x213   :  { %v721_v33 = vmax.f32 %v631_v28, 0.0  ;;  %v811_v28 = vpop.permute.xlu0 %810  ;;  %v822_v29 = vshrl.u32 %v821_v27, 7  ;;  %vm835_vm1 = vcmp.lt.s32.totalorder %v821_v27, 256 }
 0x214   :  { %v720_v34 = vmax.f32 %v626_v31, 0.0  ;;  %v1123_v35 = vpop.f32.mrb[18].mxu1 }
 0x215   :  { %v641_v36 = vadd.f32 %v1123_v35, %v1489_v62  ;;  %v635_v37 = vpop.f32.mrb[19].mxu1 }
 0x216   :  { %v1182_v38 = vpack.c.bf16 %v721_v33, %v720_v34  ;;  %v636_v39 = vadd.f32 %v1489_v62, %v635_v37 }
 0x217   :  { %v723_v40 = vmax.f32 %v641_v36, 0.0 }
 0x218   :  { %v722_v41 = vmax.f32 %v636_v39, 0.0  ;;  %1183 = vmatprep.subr.bf16.mxu0 %v1182_v38  ;;  %v1126_v42 = vpop.f32.mrb[20].mxu1 }
 0x219   :  { %1185 = vmatpush3.bf16.xpose.msra.mxu0 %v1184_v44  ;;  %v651_v43 = vadd.f32 %v1126_v42, %v1489_v62  ;;  %v645_v45 = vpop.f32.mrb[21].mxu1 }
 0x21a   :  { %v1186_v46 = vpack.c.bf16 %v723_v40, %v722_v41  ;;  %v646_v47 = vadd.f32 %v1489_v62, %v645_v45 }
 0x21b   :  { %v725_v48 = vmax.f32 %v651_v43, 0.0 }
 0x21c   :  { %1187 = vmatprep.subr.bf16.mxu0 %v1186_v46  ;;  %v724_v49 = vmax.f32 %v646_v47, 0.0  ;;  %v1129_v50 = vpop.f32.mrb[22].mxu1 }
 0x21d   :  { %v661_v52 = vadd.f32 %v1129_v50, %v1489_v62  ;;  %v655_v53 = vpop.f32.mrb[23].mxu1 }
 0x21e   :  { %v1190_v54 = vpack.c.bf16 %v725_v48, %v724_v49  ;;  %v656_v55 = vadd.f32 %v1489_v62, %v655_v53 }
 0x21f   :  { %v727_v56 = vmax.f32 %v661_v52, 0.0 }
 0x220   :  { %v726_v57 = vmax.f32 %v656_v55, 0.0  ;;  %v1132_v59 = vpop.f32.mrb[24].mxu1 }
 0x221   :  { %1189 = vmatpush3.bf16.xpose.msra.mxu0 %v1496_v51  ;;  %v671_v44 = vadd.f32 %v1132_v59, %v1489_v62  ;;  %v665_v60 = vpop.f32.mrb[25].mxu1 }
 0x222   :  { %1191 = vmatprep.subr.bf16.mxu0 %v1190_v54  ;;  %v1194_v61 = vpack.c.bf16 %v727_v56, %v726_v57  ;;  %v666_v63 = vadd.f32 %v1489_v62, %v665_v60 }
 0x223   :  { %v729_v0 = vmax.f32 %v671_v44, 0.0 }
 0x224   :  { %v728_v1 = vmax.f32 %v666_v63, 0.0  ;;  %v1135_v3 = vpop.f32.mrb[26].mxu1 }
 0x225   :  { %v681_v4 = vadd.f32 %v1135_v3, %v1489_v62  ;;  %v675_v5 = vpop.f32.mrb[27].mxu1 }
 0x226   :  { %v1198_v6 = vpack.c.bf16 %v729_v0, %v728_v1  ;;  %v676_v7 = vadd.f32 %v1489_v62, %v675_v5 }
 0x227   :  { %v731_v8 = vmax.f32 %v681_v4, 0.0 }
 0x228   :  { %v730_v10 = vmax.f32 %v676_v7, 0.0  ;;  %v1138_v11 = vpop.f32.mrb[28].mxu1 }
 0x229   :  { %1193 = vmatpush3.bf16.xpose.msra.mxu0 %v1500_v58  ;;  %v691_v51 = vadd.f32 %v1138_v11, %v1489_v62  ;;  %v685_v12 = vpop.f32.mrb[29].mxu1 }
 0x22a   :  { %1195 = vmatprep.subr.bf16.mxu0 %v1194_v61  ;;  %v1202_v13 = vpack.c.bf16 %v731_v8, %v730_v10  ;;  %v686_v14 = vadd.f32 %v1489_v62, %v685_v12 }
 0x22b   :  { %v733_v15 = vmax.f32 %v691_v51, 0.0 }
 0x22c   :  { %v732_v17 = vmax.f32 %v686_v14, 0.0  ;;  %v1141_v18 = vpop.f32.mrb[30].mxu1 }
 0x22d   :  { %v701_v19 = vadd.f32 %v1141_v18, %v1489_v62  ;;  %v695_v20 = vpop.f32.mrb[31].mxu1 }
 0x22e   :  { %v1206_v21 = vpack.c.bf16 %v733_v15, %v732_v17  ;;  %v696_v22 = vadd.f32 %v1489_v62, %v695_v20  ;;  %v1323_v62 = vmov 1966171168  }
 0x22f   :  { %v735_v24 = vmax.f32 %v701_v19, 0.0  ;;  %v819_v26 = vunpack.c.l.s4 %v1323_v62 }
 0x230   :  { %v734_v25 = vmax.f32 %v696_v22, 0.0 }
 0x231   :  { %1197 = vmatpush3.bf16.xpose.msra.mxu0 %v1504_v2  ;;  %v820_v2 = vunpack.c.0.s8 %v819_v26 }
 0x232   :  { %1199 = vmatprep.subr.bf16.mxu0 %v1198_v6  ;;  %v1210_v58 = vpack.c.bf16 %v735_v24, %v734_v25 }
 0x233   :  { %v823_v35 = vsub.s32 %v820_v2, %v822_v29 }
 0x239   :  { %1201 = vmatpush3.bf16.xpose.msra.mxu0 %v1508_v9 }
 0x23a   :  { %1203 = vmatprep.subr.bf16.mxu0 %v1202_v13 }
 0x241   :  { %1205 = vmatpush3.bf16.xpose.msra.mxu0 %v1512_v16 }
 0x242   :  { %1207 = vmatprep.subr.bf16.mxu0 %v1206_v21 }
 0x249   :  { %1209 = vmatpush3.bf16.xpose.msra.mxu0 %v1516_v23 }
 0x24a   :  { %1211 = vmatprep.subr.bf16.mxu0 %v1210_v58 }
 0x251   :  { %1213 = vmatpush3.bf16.xpose.msra.mxu0 %v1520_v30 }
 0x258   :  { %1005 = vmatmul.mubr.f32.vlgmr.msra.gmra.mrb[32].mxu0 %v1480_v32 }
 0x32b   :  { %v803_v31 = vpop.f32.mrb[32].mxu0 }
 0x32c   :  { %v813_v33 = vadd.f32 %v811_v28, %v803_v31  ;;  %v805_v9 = vpop.f32.mrb[33].mxu0 }
 0x32d   :  { %v814_v34 = vadd.f32 %v811_v28, %v805_v9 }
 0x32f   :  { %v817_v16 = vcombine.low %v813_v33, %v814_v34 }
 0x331   :  { %v824_v36 = vrot.slane %v817_v16, %v823_v35 }
 0x333   :  { %v831_v23 = vrot.slane %v824_v36, %v823_v35 }
 0x335   :  { %837 = vst.msk [vmem:[#allocation8] sm:$0x3] %vm835_vm1, %v831_v23 }
 0x336   :  { %842 = vsyncadd [#allocation4], 16  ;;  %s1324_s3 = smov [#allocation8]  }
 0x337   :  { %s844_s4 = sshll.u32 %s1324_s3, 4  ;;  %s845_s4 = int_to_ptr.vmem [resolvable:$true] %s844_s4 }
 0x338   :  { %s1289_s12 = scalar_lea.vmem %s845_s4, 16  ;;  %s1293_s13 = scalar_lea.vmem %s845_s4, 32 }
 0x339   :  { %p1290_p10 = scmp.ne.s32.totalorder %s845_s4, %s1289_s12  ;;  %p1294_p11 = scmp.lt.s32.totalorder %s845_s4, %s845_s4 }
 0x33a   :  { %p1295_p12 = scmp.lt.s32.totalorder %s1293_s13, %s1289_s12 }
 0x33c   :  { %p1296_p13 = por %p1295_p12, %p1294_p11 }
 0x33e   :  { %p1297_p0 = pnand %p1296_p13, %p1290_p10 }
 0x340   :  { %1300 = shalt.err (!%p1297_p0)
}
 0x341   :  { %s1301_s16 = scalar_lea.hbm %s1562_s5, 16 }
 0x342   :  { %p1302_p1 = scmp.ne.s32.totalorder %s1562_s5, %s1301_s16  ;;  %p1305_p2 = scmp.lt.u32.totalorder %s1301_s16, %s1562_s5 }
 0x344   :  { %p1307_p3 = pnand %p1305_p2, %p1302_p1 }
 0x346   :  { %1310 = shalt.err (!%p1307_p3)
}
 0x347   :  { %847 = dma.vmem_to_hbm [thread:$0]  %s845_s4, 16, %s1562_s5, [#allocation4]  }
 0x348   :  { %1315 = dma.done.wait [#allocation4], 32  }
 0x349   :  { %1316 = vsyncadd [#allocation4], 4294967264 }
 0x34a   :  { %851 = vsyncpa [#allocation3], 1 }
 0x34b   :  { %852 = vsyncpa [#allocation6], 1 }
 0x34c   :  { %853 = vsyncpa [#allocation4], 1 }

// kernel: tpu_custom_call.1
= control target key start
LH: loop header
LB: loop body
LE: loop exit
PB: predicated region body
PF: predicated region fallthrough
CT: control target
= control target key end

     0   :  { %10 = vsyncpa [#allocation3], 0  ;;  %s1557_s0 = inlined_call_operand.hbm [shape: f32[16,32], index: 0, kind: input, shape index: {}]   ;;  %s1558_s1 = inlined_call_operand.hbm [shape: f32[32,128], index: 1, kind: input, shape index: {}]   ;;  %s1559_s2 = inlined_call_operand.hbm [shape: f32[128,128], index: 2, kind: input, shape index: {}]   ;;  %s1560_s3 = inlined_call_operand.vmem [shape: f32[8,128], index: 3, kind: input, shape index: {}]   ;;  %s1561_s4 = inlined_call_operand.vmem [shape: f32[3,128], index: 4, kind: input, shape index: {}]   ;;  %s1562_s5 = inlined_call_operand.hbm [shape: f32[1,16], index: 5, kind: output, shape index: {}]  }
   0x1   :  { %11 = vsyncpa [#allocation6], 0 }
   0x2   :  { %12 = vsyncpa [#allocation4], 0 }
   0x3   :  { %17 = vsyncadd [#allocation3], 3840  ;;  %s1317_s18 = smov [#allocation5]   ;;  %s1318_s20 = smov [#allocation2]  }
   0x4   :  { %s30_s19 = sshll.u32 %s1317_s18, 4  ;;  %s18_s21 = sshll.u32 %s1318_s20, 4  ;;  %s31_s19 = int_to_ptr.vmem [resolvable:$true] %s30_s19  ;;  %s1355_s21 = int_to_ptr.vmem [resolvable:$true] %s18_s21 }
   0x5   :  { %s1223_s24 = scalar_lea.hbm %s1558_s1, 512 }
   0x6   :  { %p1224_p0 = scmp.ne.s32.totalorder %s1558_s1, %s1223_s24  ;;  %p1227_p1 = scmp.lt.u32.totalorder %s1223_s24, %s1558_s1 }
   0x8   :  { %p1229_p2 = pnand %p1227_p1, %p1224_p0 }
   0xa   :  { %1232 = shalt.err (!%p1229_p2)
}
   0xb   :  { %s1233_s29 = scalar_lea.vmem %s31_s19, 512  ;;  %p1238_p4 = scmp.lt.s32.totalorder %s31_s19, %s31_s19 }
   0xc   :  { %p1234_p3 = scmp.ne.s32.totalorder %s31_s19, %s1233_s29  ;;  %p1239_p5 = scmp.lt.s32.totalorder %s1233_s29, %s1233_s29 }
   0xe   :  { %p1240_p6 = por %p1239_p5, %p1238_p4 }
  0x10   :  { %p1241_p7 = pnand %p1240_p6, %p1234_p3 }
  0x12   :  { %1244 = shalt.err (!%p1241_p7)
}
  0x13   :  { %s1319_s30 = smov 128   ;;  %s1320_s6 = smov 8  }
  0x14   :  { %36 = dma.hbm_to_vmem [thread:$0]  %s1558_s1, 512, %s31_s19, [#allocation6], %s1319_s30, %s1319_s30, %s1320_s6  }
  0x15   :  { %s1245_s11 = scalar_lea.hbm %s1557_s0, 256 }
  0x16   :  { %p1246_p8 = scmp.ne.s32.totalorder %s1557_s0, %s1245_s11  ;;  %p1249_p9 = scmp.lt.u32.totalorder %s1245_s11, %s1557_s0 }
  0x18   :  { %p1251_p10 = pnand %p1249_p9, %p1246_p8 }
  0x1a   :  { %1254 = shalt.err (!%p1251_p10)
}
  0x1b   :  { %s1255_s16 = scalar_lea.vmem %s1355_s21, 256  ;;  %s1259_s1 = scalar_lea.vmem %s1355_s21, 4096 }
  0x1c   :  { %p1256_p11 = scmp.ne.s32.totalorder %s1355_s21, %s1255_s16  ;;  %p1260_p12 = scmp.lt.s32.totalorder %s1355_s21, %s1355_s21 }
  0x1d   :  { %p1261_p13 = scmp.lt.s32.totalorder %s1259_s1, %s1255_s16 }
  0x1f   :  { %p1262_p0 = por %p1261_p13, %p1260_p12 }
  0x21   :  { %p1263_p1 = pnand %p1262_p0, %p1256_p11 }
  0x23   :  { %1266 = shalt.err (!%p1263_p1)
}
  0x24   :  { %24 = dma.hbm_to_vmem [thread:$0]  %s1557_s0, 256, %s1355_s21, [#allocation3], %s1319_s30, %s1319_s30, %s1320_s6  }
  0x25   :  { %s1321_s19 = smov [#allocation7]   ;;  %s1267_s24 = scalar_lea.hbm %s1559_s2, 2048 }
  0x26   :  { %s42_s20 = sshll.u32 %s1321_s19, 4  ;;  %p1268_p2 = scmp.ne.s32.totalorder %s1559_s2, %s1267_s24  ;;  %s43_s20 = int_to_ptr.vmem [resolvable:$true] %s42_s20 }
  0x27   :  { %p1271_p3 = scmp.lt.u32.totalorder %s1267_s24, %s1559_s2 }
  0x29   :  { %p1273_p4 = pnand %p1271_p3, %p1268_p2 }
  0x2b   :  { %1276 = shalt.err (!%p1273_p4)
}
  0x2c   :  { %s1277_s29 = scalar_lea.vmem %s43_s20, 2048  ;;  %p1282_p6 = scmp.lt.s32.totalorder %s43_s20, %s43_s20 }
  0x2d   :  { %p1278_p5 = scmp.ne.s32.totalorder %s43_s20, %s1277_s29  ;;  %p1283_p7 = scmp.lt.s32.totalorder %s1277_s29, %s1277_s29 }
  0x2f   :  { %p1284_p8 = por %p1283_p7, %p1282_p6 }
  0x31   :  { %p1285_p9 = pnand %p1284_p8, %p1278_p5 }
  0x33   :  { %1288 = shalt.err (!%p1285_p9)
}
  0x34   :  { %48 = dma.hbm_to_vmem [thread:$0]  %s1559_s2, 2048, %s43_s20, [#allocation6], %s1319_s30, %s1319_s30, %s1320_s6  }
  0x35   :  { %1311 = dma.done.wait [#allocation3], 4096  }
  0x36   :  { %1312 = vsyncadd [#allocation3], 4294963200 }
  0x37   :  { %1313 = dma.done.wait [#allocation6], 2560  }
  0x38   :  { %1314 = vsyncadd [#allocation6], 4294964736  ;;  %vm105_vm0 = vcmask 261120   ;;  %v97_v0 = vld [vmem:[#allocation5] sm:$0xff]  ;;  %v98_v1 = vld [vmem:[#allocation5 + $0x8] sm:$0xff] }
  0x39   :  { %v99_v2 = vld [vmem:[#allocation5 + $0x10] sm:$0xff]  ;;  %v1142_v3 = vpack.c.bf16 %v98_v1, %v97_v0  ;;  %v100_v4 = vld [vmem:[#allocation5 + $0x18] sm:$0xff]  ;;  %v62_v5 = vld [vmem:[#allocation2] sm:$0xff] }
  0x3a   :  { %v1146_v6 = vpack.c.bf16 %v100_v4, %v99_v2  ;;  %1014 = vmatprep.mubr.msk.f32.mxu0 %vm105_vm0, %v62_v5  ;;  %v63_v7 = vld [vmem:[#allocation2 + $0x8] sm:$0xff]  ;;  %v64_v8 = vld [vmem:[#allocation2 + $0x10] sm:$0xff]  ;;  %v65_v9 = vld [vmem:[#allocation2 + $0x18] sm:$0xff] }
  0x3b   :  { %1143 = vmatprep.subr.bf16.mxu0 %v1142_v3  ;;  %v459_v10 = vld [vmem:[#allocation7] sm:$0xff]  ;;  %v460_v11 = vld [vmem:[#allocation7 + $0x8] sm:$0xff]  ;;  %v461_v12 = vld [vmem:[#allocation7 + $0x10] sm:$0xff] }
  0x3c   :  { %1145 = vmatpush3.bf16.msra.mxu0 %v1142_v3  ;;  %v66_v13 = vld [vmem:[#allocation2 + $0x20] sm:$0xff]  ;;  %v1150_v14 = vpack.c.bf16 %v460_v11, %v459_v10  ;;  %v462_v15 = vld [vmem:[#allocation7 + $0x18] sm:$0xff]  ;;  %v464_v18 = vld [vmem:[#allocation7 + $0x28] sm:$0xff] }
  0x3d   :  { %1147 = vmatprep.subr.bf16.mxu0 %v1146_v6  ;;  %v1154_v16 = vpack.c.bf16 %v462_v15, %v461_v12  ;;  %v463_v17 = vld [vmem:[#allocation7 + $0x20] sm:$0xff]  ;;  %v67_v19 = vld [vmem:[#allocation2 + $0x28] sm:$0xff]  ;;  %v68_v20 = vld [vmem:[#allocation2 + $0x30] sm:$0xff] }
  0x3e   :  { %1151 = vmatprep.subr.bf16.mxu1 %v1150_v14  ;;  %v1158_v21 = vpack.c.bf16 %v464_v18, %v463_v17  ;;  %v465_v22 = vld [vmem:[#allocation7 + $0x30] sm:$0xff]  ;;  %v466_v23 = vld [vmem:[#allocation7 + $0x38] sm:$0xff]  ;;  %v70_v25 = vld [vmem:[#allocation2 + $0x40] sm:$0xff] }
  0x3f   :  { %1153 = vmatpush3.bf16.msra.mxu1 %v1150_v14  ;;  %v69_v24 = vld [vmem:[#allocation2 + $0x38] sm:$0xff]  ;;  %v1162_v26 = vpack.c.bf16 %v466_v23, %v465_v22  ;;  %v467_v27 = vld [vmem:[#allocation7 + $0x40] sm:$0xff]  ;;  %v468_v28 = vld [vmem:[#allocation7 + $0x48] sm:$0xff] }
  0x40   :  { %1149 = vmatpush3.bf16.msra.mxu0 %v1146_v6  ;;  %1155 = vmatprep.subr.bf16.mxu1 %v1154_v16  ;;  %v71_v29 = vld [vmem:[#allocation2 + $0x48] sm:$0xff]  ;;  %v72_v30 = vld [vmem:[#allocation2 + $0x50] sm:$0xff]  ;;  %v1166_v31 = vpack.c.bf16 %v468_v28, %v467_v27  ;;  %v470_v33 = vld [vmem:[#allocation7 + $0x58] sm:$0xff] }
  0x41   :  { %v469_v32 = vld [vmem:[#allocation7 + $0x50] sm:$0xff]  ;;  %v73_v34 = vld [vmem:[#allocation2 + $0x58] sm:$0xff]  ;;  %v74_v35 = vld [vmem:[#allocation2 + $0x60] sm:$0xff] }
  0x42   :  { %v1170_v36 = vpack.c.bf16 %v470_v33, %v469_v32  ;;  %v471_v37 = vld [vmem:[#allocation7 + $0x60] sm:$0xff]  ;;  %v472_v38 = vld [vmem:[#allocation7 + $0x68] sm:$0xff]  ;;  %v76_v40 = vld [vmem:[#allocation2 + $0x70] sm:$0xff] }
  0x43   :  { %1015 = vmatmul.mubr.msk.f32.vlgmr.msra.gmra.mrb[0].mxu0 %vm105_vm0, %v63_v7  ;;  %1157 = vmatpush3.bf16.msra.mxu1 %v1154_v16  ;;  %v75_v39 = vld [vmem:[#allocation2 + $0x68] sm:$0xff]  ;;  %v1174_v41 = vpack.c.bf16 %v472_v38, %v471_v37  ;;  %v77_v42 = vld [vmem:[#allocation2 + $0x78] sm:$0xff]  ;;  %v78_v43 = vld [vmem:[#allocation2 + $0x80] sm:$0xff] }
  0x44   :  { %1017 = vmatprep.mubr.msk.f32.mxu0 %vm105_vm0, %v64_v8  ;;  %1159 = vmatprep.subr.bf16.mxu1 %v1158_v21  ;;  %v79_v44 = vld [vmem:[#allocation2 + $0x88] sm:$0xff]  ;;  %v80_v45 = vld [vmem:[#allocation2 + $0x90] sm:$0xff]  ;;  %v81_v46 = vld [vmem:[#allocation2 + $0x98] sm:$0xff] }
  0x45   :  { %v82_v47 = vld [vmem:[#allocation2 + $0xa0] sm:$0xff]  ;;  %v83_v48 = vld [vmem:[#allocation2 + $0xa8] sm:$0xff]  ;;  %v84_v49 = vld [vmem:[#allocation2 + $0xb0] sm:$0xff] }
  0x46   :  { %v85_v50 = vld [vmem:[#allocation2 + $0xb8] sm:$0xff]  ;;  %v86_v51 = vld [vmem:[#allocation2 + $0xc0] sm:$0xff]  ;;  %v87_v52 = vld [vmem:[#allocation2 + $0xc8] sm:$0xff] }
  0x47   :  { %1018 = vmatmul.mubr.msk.f32.gmra.mrb[2].mxu0 %vm105_vm0, %v65_v9  ;;  %1161 = vmatpush3.bf16.msra.mxu1 %v1158_v21  ;;  %v88_v53 = vld [vmem:[#allocation2 + $0xd0] sm:$0xff]  ;;  %v89_v54 = vld [vmem:[#allocation2 + $0xd8] sm:$0xff]  ;;  %v90_v55 = vld [vmem:[#allocation2 + $0xe0] sm:$0xff] }
  0x48   :  { %1020 = vmatprep.mubr.msk.f32.mxu0 %vm105_vm0, %v66_v13  ;;  %1163 = vmatprep.subr.bf16.mxu1 %v1162_v26  ;;  %v91_v56 = vld [vmem:[#allocation2 + $0xe8] sm:$0xff]  ;;  %v92_v57 = vld [vmem:[#allocation2 + $0xf0] sm:$0xff]  ;;  %v93_v58 = vld [vmem:[#allocation2 + $0xf8] sm:$0xff] }
  0x49   :  { %v473_v59 = vld [vmem:[#allocation7 + $0x70] sm:$0xff]  ;;  %v474_v60 = vld [vmem:[#allocation7 + $0x78] sm:$0xff]  ;;  %v1443_v62 = vld [vmem:[%s1561_s4] ss:$0 sm:$0xff] }
  0x4a   :  { %v1178_v61 = vpack.c.bf16 %v474_v60, %v473_v59 }
  0x4b   :  { %1021 = vmatmul.mubr.msk.f32.gmra.mrb[4].mxu0 %vm105_vm0, %v67_v19  ;;  %1165 = vmatpush3.bf16.msra.mxu1 %v1162_v26 }
  0x4c   :  { %1023 = vmatprep.mubr.msk.f32.mxu0 %vm105_vm0, %v68_v20  ;;  %1167 = vmatprep.subr.bf16.mxu1 %v1166_v31 }
  0x4f   :  { %1024 = vmatmul.mubr.msk.f32.gmra.mrb[6].mxu0 %vm105_vm0, %v69_v24  ;;  %1169 = vmatpush3.bf16.msra.mxu1 %v1166_v31 }
  0x50   :  { %1026 = vmatprep.mubr.msk.f32.mxu0 %vm105_vm0, %v70_v25  ;;  %1171 = vmatprep.subr.bf16.mxu1 %v1170_v36 }
  0x53   :  { %1027 = vmatmul.mubr.msk.f32.gmra.mrb[8].mxu0 %vm105_vm0, %v71_v29  ;;  %1173 = vmatpush3.bf16.msra.mxu1 %v1170_v36 }
  0x54   :  { %1029 = vmatprep.mubr.msk.f32.mxu0 %vm105_vm0, %v72_v30  ;;  %1175 = vmatprep.subr.bf16.mxu1 %v1174_v41 }
  0x57   :  { %1030 = vmatmul.mubr.msk.f32.gmra.mrb[10].mxu0 %vm105_vm0, %v73_v34  ;;  %1177 = vmatpush3.bf16.msra.mxu1 %v1174_v41 }
  0x58   :  { %1032 = vmatprep.mubr.msk.f32.mxu0 %vm105_vm0, %v74_v35  ;;  %1179 = vmatprep.subr.bf16.mxu1 %v1178_v61 }
  0x5b   :  { %1033 = vmatmul.mubr.msk.f32.gmra.mrb[12].mxu0 %vm105_vm0, %v75_v39  ;;  %1181 = vmatpush3.bf16.msra.mxu1 %v1178_v61 }
  0x5c   :  { %1035 = vmatprep.mubr.msk.f32.mxu0 %vm105_vm0, %v76_v40 }
  0x5f   :  { %1036 = vmatmul.mubr.msk.f32.gmra.mrb[14].mxu0 %vm105_vm0, %v77_v42 }
  0x60   :  { %1038 = vmatprep.mubr.msk.f32.mxu0 %vm105_vm0, %v78_v43 }
  0x63   :  { %1039 = vmatmul.mubr.msk.f32.gmra.mrb[16].mxu0 %vm105_vm0, %v79_v44 }
  0x64   :  { %1041 = vmatprep.mubr.msk.f32.mxu0 %vm105_vm0, %v80_v45 }
  0x67   :  { %1042 = vmatmul.mubr.msk.f32.gmra.mrb[18].mxu0 %vm105_vm0, %v81_v46 }
  0x68   :  { %1044 = vmatprep.mubr.msk.f32.mxu0 %vm105_vm0, %v82_v47 }
  0x6b   :  { %1045 = vmatmul.mubr.msk.f32.gmra.mrb[20].mxu0 %vm105_vm0, %v83_v48 }
  0x6c   :  { %1047 = vmatprep.mubr.msk.f32.mxu0 %vm105_vm0, %v84_v49 }
  0x6f   :  { %1048 = vmatmul.mubr.msk.f32.gmra.mrb[22].mxu0 %vm105_vm0, %v85_v50 }
  0x70   :  { %1050 = vmatprep.mubr.msk.f32.mxu0 %vm105_vm0, %v86_v51 }
  0x73   :  { %1051 = vmatmul.mubr.msk.f32.gmra.mrb[24].mxu0 %vm105_vm0, %v87_v52 }
  0x74   :  { %1053 = vmatprep.mubr.msk.f32.mxu0 %vm105_vm0, %v88_v53 }
  0x77   :  { %1054 = vmatmul.mubr.msk.f32.gmra.mrb[26].mxu0 %vm105_vm0, %v89_v54 }
  0x78   :  { %1056 = vmatprep.mubr.msk.f32.mxu0 %vm105_vm0, %v90_v55 }
  0x7b   :  { %1057 = vmatmul.mubr.msk.f32.gmra.mrb[28].mxu0 %vm105_vm0, %v91_v56 }
  0x7c   :  { %1059 = vmatprep.mubr.msk.f32.mxu0 %vm105_vm0, %v92_v57 }
  0x7f   :  { %1060 = vmatmul.mubr.msk.f32.gmra.mrb[30].mxu0 %vm105_vm0, %v93_v58 }
 0x116   :  { %v1016_v63 = vpop.f32.mrb[0].mxu0 }
 0x117   :  { %v274_v0 = vadd.f32 %v1016_v63, %v1443_v62  ;;  %v268_v1 = vpop.f32.mrb[1].mxu0 }
 0x118   :  { %v269_v2 = vadd.f32 %v1443_v62, %v268_v1 }
 0x119   :  { %v428_v5 = vmax.f32 %v274_v0, 0.0 }
 0x11a   :  { %v1019_v3 = vpop.f32.mrb[2].mxu0  ;;  %v427_v4 = vmax.f32 %v269_v2, 0.0 }
 0x11b   :  { %v284_v6 = vadd.f32 %v1019_v3, %v1443_v62  ;;  %v278_v7 = vpop.f32.mrb[3].mxu0 }
 0x11c   :  { %v279_v8 = vadd.f32 %v1443_v62, %v278_v7  ;;  %1094 = vmatprep.mubr.f32.mxu1 %v427_v4 }
 0x11d   :  { %1095 = vmatmul.mubr.f32.vlgmr.msra.gmra.mrb[0].mxu1 %v428_v5  ;;  %v430_v11 = vmax.f32 %v284_v6, 0.0 }
 0x11e   :  { %v429_v9 = vmax.f32 %v279_v8, 0.0  ;;  %v1022_v10 = vpop.f32.mrb[4].mxu0 }
 0x11f   :  { %v294_v12 = vadd.f32 %v1022_v10, %v1443_v62  ;;  %v288_v13 = vpop.f32.mrb[5].mxu0 }
 0x120   :  { %v289_v14 = vadd.f32 %v1443_v62, %v288_v13  ;;  %1097 = vmatprep.mubr.f32.mxu1 %v429_v9 }
 0x121   :  { %1098 = vmatmul.mubr.f32.gmra.mrb[2].mxu1 %v430_v11  ;;  %v432_v17 = vmax.f32 %v294_v12, 0.0 }
 0x122   :  { %v431_v15 = vmax.f32 %v289_v14, 0.0  ;;  %v1025_v16 = vpop.f32.mrb[6].mxu0 }
 0x123   :  { %v304_v18 = vadd.f32 %v1025_v16, %v1443_v62  ;;  %v298_v19 = vpop.f32.mrb[7].mxu0 }
 0x124   :  { %v299_v20 = vadd.f32 %v1443_v62, %v298_v19  ;;  %1100 = vmatprep.mubr.f32.mxu1 %v431_v15 }
 0x125   :  { %1101 = vmatmul.mubr.f32.gmra.mrb[4].mxu1 %v432_v17  ;;  %v434_v23 = vmax.f32 %v304_v18, 0.0 }
 0x126   :  { %v433_v21 = vmax.f32 %v299_v20, 0.0  ;;  %v1028_v22 = vpop.f32.mrb[8].mxu0 }
 0x127   :  { %v314_v24 = vadd.f32 %v1028_v22, %v1443_v62  ;;  %v308_v25 = vpop.f32.mrb[9].mxu0 }
 0x128   :  { %v309_v26 = vadd.f32 %v1443_v62, %v308_v25  ;;  %1103 = vmatprep.mubr.f32.mxu1 %v433_v21 }
 0x129   :  { %1104 = vmatmul.mubr.f32.gmra.mrb[6].mxu1 %v434_v23  ;;  %v436_v29 = vmax.f32 %v314_v24, 0.0 }
 0x12a   :  { %v435_v27 = vmax.f32 %v309_v26, 0.0  ;;  %v1031_v28 = vpop.f32.mrb[10].mxu0 }
 0x12b   :  { %v324_v30 = vadd.f32 %v1031_v28, %v1443_v62  ;;  %v318_v31 = vpop.f32.mrb[11].mxu0 }
 0x12c   :  { %v319_v32 = vadd.f32 %v1443_v62, %v318_v31  ;;  %1106 = vmatprep.mubr.f32.mxu1 %v435_v27 }
 0x12d   :  { %1107 = vmatmul.mubr.f32.gmra.mrb[8].mxu1 %v436_v29  ;;  %v438_v35 = vmax.f32 %v324_v30, 0.0 }
 0x12e   :  { %v437_v33 = vmax.f32 %v319_v32, 0.0  ;;  %v1034_v34 = vpop.f32.mrb[12].mxu0  ;;  %v1480_v32 = vld [vmem:[%s1560_s3] sm:$0xff] }
 0x12f   :  { %v334_v36 = vadd.f32 %v1034_v34, %v1443_v62  ;;  %v328_v37 = vpop.f32.mrb[13].mxu0  ;;  %1004 = vmatprep.mubr.f32.mxu0 %v1480_v32  ;;  %v1322_v34 = vmov 0  }
 0x130   :  { %v329_v38 = vadd.f32 %v1443_v62, %v328_v37  ;;  %1109 = vmatprep.mubr.f32.mxu1 %v437_v33  ;;  %v96_v33 = vld [vmem:[%s1561_s4 + $0x2] sm:$0x1]  ;;  %1222 = vset.pattern.permute.xlu0 %v1322_v34 }
 0x131   :  { %1110 = vmatmul.mubr.f32.gmra.mrb[10].mxu1 %v438_v35  ;;  %v440_v41 = vmax.f32 %v334_v36, 0.0  ;;  %810 = vperm.xlu0 %1222, %v96_v33  }
 0x132   :  { %v439_v39 = vmax.f32 %v329_v38, 0.0  ;;  %v1037_v40 = vpop.f32.mrb[14].mxu0 }
 0x133   :  { %v344_v42 = vadd.f32 %v1037_v40, %v1443_v62  ;;  %v338_v43 = vpop.f32.mrb[15].mxu0 }
 0x134   :  { %v339_v44 = vadd.f32 %v1443_v62, %v338_v43  ;;  %1112 = vmatprep.mubr.f32.mxu1 %v439_v39 }
 0x135   :  { %1113 = vmatmul.mubr.f32.gmra.mrb[12].mxu1 %v440_v41  ;;  %v442_v47 = vmax.f32 %v344_v42, 0.0 }
 0x136   :  { %v441_v45 = vmax.f32 %v339_v44, 0.0  ;;  %v1040_v46 = vpop.f32.mrb[16].mxu0 }
 0x137   :  { %v354_v48 = vadd.f32 %v1040_v46, %v1443_v62  ;;  %v348_v49 = vpop.f32.mrb[17].mxu0 }
 0x138   :  { %v349_v50 = vadd.f32 %v1443_v62, %v348_v49  ;;  %1115 = vmatprep.mubr.f32.mxu1 %v441_v45 }
 0x139   :  { %1116 = vmatmul.mubr.f32.gmra.mrb[14].mxu1 %v442_v47  ;;  %v444_v53 = vmax.f32 %v354_v48, 0.0 }
 0x13a   :  { %v443_v51 = vmax.f32 %v349_v50, 0.0  ;;  %v1043_v52 = vpop.f32.mrb[18].mxu0 }
 0x13b   :  { %v364_v54 = vadd.f32 %v1043_v52, %v1443_v62  ;;  %v358_v55 = vpop.f32.mrb[19].mxu0 }
 0x13c   :  { %v359_v56 = vadd.f32 %v1443_v62, %v358_v55  ;;  %1118 = vmatprep.mubr.f32.mxu1 %v443_v51 }
 0x13d   :  { %v446_v57 = vmax.f32 %v364_v54, 0.0  ;;  %1119 = vmatmul.mubr.f32.gmra.mrb[16].mxu1 %v444_v53 }
 0x13e   :  { %v445_v58 = vmax.f32 %v359_v56, 0.0  ;;  %v1046_v59 = vpop.f32.mrb[20].mxu0 }
 0x13f   :  { %v374_v60 = vadd.f32 %v1046_v59, %v1443_v62  ;;  %v368_v61 = vpop.f32.mrb[21].mxu0 }
 0x140   :  { %1121 = vmatprep.mubr.f32.mxu1 %v445_v58  ;;  %v369_v63 = vadd.f32 %v1443_v62, %v368_v61 }
 0x141   :  { %1122 = vmatmul.mubr.f32.gmra.mrb[18].mxu1 %v446_v57  ;;  %v448_v0 = vmax.f32 %v374_v60, 0.0 }
 0x142   :  { %v447_v1 = vmax.f32 %v369_v63, 0.0  ;;  %v1049_v2 = vpop.f32.mrb[22].mxu0 }
 0x143   :  { %v384_v3 = vadd.f32 %v1049_v2, %v1443_v62  ;;  %v378_v4 = vpop.f32.mrb[23].mxu0 }
 0x144   :  { %1124 = vmatprep.mubr.f32.mxu1 %v447_v1  ;;  %v379_v5 = vadd.f32 %v1443_v62, %v378_v4 }
 0x145   :  { %1125 = vmatmul.mubr.f32.gmra.mrb[20].mxu1 %v448_v0  ;;  %v450_v6 = vmax.f32 %v384_v3, 0.0 }
 0x146   :  { %v449_v7 = vmax.f32 %v379_v5, 0.0  ;;  %v1052_v8 = vpop.f32.mrb[24].mxu0 }
 0x147   :  { %v394_v9 = vadd.f32 %v1052_v8, %v1443_v62  ;;  %v388_v10 = vpop.f32.mrb[25].mxu0 }
 0x148   :  { %1127 = vmatprep.mubr.f32.mxu1 %v449_v7  ;;  %v389_v11 = vadd.f32 %v1443_v62, %v388_v10 }
 0x149   :  { %1128 = vmatmul.mubr.f32.gmra.mrb[22].mxu1 %v450_v6  ;;  %v452_v12 = vmax.f32 %v394_v9, 0.0 }
 0x14a   :  { %v451_v13 = vmax.f32 %v389_v11, 0.0  ;;  %v1055_v14 = vpop.f32.mrb[26].mxu0 }
 0x14b   :  { %v404_v15 = vadd.f32 %v1055_v14, %v1443_v62  ;;  %v398_v16 = vpop.f32.mrb[27].mxu0 }
 0x14c   :  { %1130 = vmatprep.mubr.f32.mxu1 %v451_v13  ;;  %v399_v17 = vadd.f32 %v1443_v62, %v398_v16 }
 0x14d   :  { %1131 = vmatmul.mubr.f32.gmra.mrb[24].mxu1 %v452_v12  ;;  %v454_v18 = vmax.f32 %v404_v15, 0.0 }
 0x14e   :  { %v453_v19 = vmax.f32 %v399_v17, 0.0  ;;  %v1058_v20 = vpop.f32.mrb[28].mxu0 }
 0x14f   :  { %v414_v21 = vadd.f32 %v1058_v20, %v1443_v62  ;;  %v408_v22 = vpop.f32.mrb[29].mxu0 }
 0x150   :  { %1133 = vmatprep.mubr.f32.mxu1 %v453_v19  ;;  %v409_v23 = vadd.f32 %v1443_v62, %v408_v22 }
 0x151   :  { %1134 = vmatmul.mubr.f32.gmra.mrb[26].mxu1 %v454_v18  ;;  %v456_v24 = vmax.f32 %v414_v21, 0.0 }
 0x152   :  { %v455_v25 = vmax.f32 %v409_v23, 0.0  ;;  %v1061_v26 = vpop.f32.mrb[30].mxu0 }
 0x153   :  { %v424_v27 = vadd.f32 %v1061_v26, %v1443_v62  ;;  %v418_v28 = vpop.f32.mrb[31].mxu0 }
 0x154   :  { %1136 = vmatprep.mubr.f32.mxu1 %v455_v25  ;;  %v419_v29 = vadd.f32 %v1443_v62, %v418_v28  ;;  %v1489_v62 = vld [vmem:[%s1561_s4 + $0x1] ss:$0 sm:$0xff] }
 0x155   :  { %1137 = vmatmul.mubr.f32.gmra.mrb[28].mxu1 %v456_v24  ;;  %v458_v30 = vmax.f32 %v424_v27, 0.0 }
 0x156   :  { %v457_v31 = vmax.f32 %v419_v29, 0.0 }
 0x158   :  { %1139 = vmatprep.mubr.f32.mxu1 %v457_v31 }
 0x159   :  { %1140 = vmatmul.mubr.f32.gmra.mrb[30].mxu1 %v458_v30 }
 0x1f0   :  { %v1096_v35 = vpop.f32.mrb[0].mxu1 }
 0x1f1   :  { %v551_v36 = vadd.f32 %v1096_v35, %v1489_v62  ;;  %v545_v37 = vpop.f32.mrb[1].mxu1 }
 0x1f2   :  { %v546_v38 = vadd.f32 %v1489_v62, %v545_v37 }
 0x1f3   :  { %v705_v39 = vmax.f32 %v551_v36, 0.0 }
 0x1f4   :  { %v704_v40 = vmax.f32 %v546_v38, 0.0  ;;  %v1099_v41 = vpop.f32.mrb[2].mxu1 }
 0x1f5   :  { %v561_v42 = vadd.f32 %v1099_v41, %v1489_v62  ;;  %v555_v43 = vpop.f32.mrb[3].mxu1 }
 0x1f6   :  { %v1184_v44 = vpack.c.bf16 %v705_v39, %v704_v40  ;;  %v556_v45 = vadd.f32 %v1489_v62, %v555_v43 }
 0x1f7   :  { %v707_v46 = vmax.f32 %v561_v42, 0.0 }
 0x1f8   :  { %v706_v47 = vmax.f32 %v556_v45, 0.0  ;;  %v1102_v48 = vpop.f32.mrb[4].mxu1 }
 0x1f9   :  { %v571_v49 = vadd.f32 %v1102_v48, %v1489_v62  ;;  %v565_v50 = vpop.f32.mrb[5].mxu1 }
 0x1fa   :  { %v1496_v51 = vpack.c.bf16 %v707_v46, %v706_v47  ;;  %v566_v52 = vadd.f32 %v1489_v62, %v565_v50 }
 0x1fb   :  { %v709_v53 = vmax.f32 %v571_v49, 0.0 }
 0x1fc   :  { %v708_v54 = vmax.f32 %v566_v52, 0.0  ;;  %v1105_v55 = vpop.f32.mrb[6].mxu1 }
 0x1fd   :  { %v581_v56 = vadd.f32 %v1105_v55, %v1489_v62  ;;  %v575_v57 = vpop.f32.mrb[7].mxu1 }
 0x1fe   :  { %v1500_v58 = vpack.c.bf16 %v709_v53, %v708_v54  ;;  %v576_v59 = vadd.f32 %v1489_v62, %v575_v57 }
 0x1ff   :  { %v711_v60 = vmax.f32 %v581_v56, 0.0 }
 0x200   :  { %v710_v61 = vmax.f32 %v576_v59, 0.0  ;;  %v1108_v63 = vpop.f32.mrb[8].mxu1 }
 0x201   :  { %v591_v0 = vadd.f32 %v1108_v63, %v1489_v62  ;;  %v585_v1 = vpop.f32.mrb[9].mxu1 }
 0x202   :  { %v1504_v2 = vpack.c.bf16 %v711_v60, %v710_v61  ;;  %v586_v3 = vadd.f32 %v1489_v62, %v585_v1 }
 0x203   :  { %v713_v4 = vmax.f32 %v591_v0, 0.0 }
 0x204   :  { %v712_v5 = vmax.f32 %v586_v3, 0.0  ;;  %v1111_v6 = vpop.f32.mrb[10].mxu1 }
 0x205   :  { %v601_v7 = vadd.f32 %v1111_v6, %v1489_v62  ;;  %v595_v8 = vpop.f32.mrb[11].mxu1 }
 0x206   :  { %v1508_v9 = vpack.c.bf16 %v713_v4, %v712_v5  ;;  %v596_v10 = vadd.f32 %v1489_v62, %v595_v8 }
 0x207   :  { %v715_v11 = vmax.f32 %v601_v7, 0.0 }
 0x208   :  { %v714_v12 = vmax.f32 %v596_v10, 0.0  ;;  %v1114_v13 = vpop.f32.mrb[12].mxu1 }
 0x209   :  { %v611_v14 = vadd.f32 %v1114_v13, %v1489_v62  ;;  %v605_v15 = vpop.f32.mrb[13].mxu1 }
 0x20a   :  { %v1512_v16 = vpack.c.bf16 %v715_v11, %v714_v12  ;;  %v606_v17 = vadd.f32 %v1489_v62, %v605_v15 }
 0x20b   :  { %v717_v18 = vmax.f32 %v611_v14, 0.0 }
 0x20c   :  { %v716_v19 = vmax.f32 %v606_v17, 0.0  ;;  %v1117_v20 = vpop.f32.mrb[14].mxu1 }
 0x20d   :  { %v621_v21 = vadd.f32 %v1117_v20, %v1489_v62  ;;  %v615_v22 = vpop.f32.mrb[15].mxu1 }
 0x20e   :  { %v1516_v23 = vpack.c.bf16 %v717_v18, %v716_v19  ;;  %v616_v24 = vadd.f32 %v1489_v62, %v615_v22 }
 0x20f   :  { %v719_v25 = vmax.f32 %v621_v21, 0.0 }
 0x210   :  { %v718_v26 = vmax.f32 %v616_v24, 0.0  ;;  %v1120_v27 = vpop.f32.mrb[16].mxu1 }
 0x211   :  { %v631_v28 = vadd.f32 %v1120_v27, %v1489_v62  ;;  %v625_v29 = vpop.f32.mrb[17].mxu1  ;;  %v821_v27 = vlaneseq }
 0x212   :  { %v1520_v30 = vpack.c.bf16 %v719_v25, %v718_v26  ;;  %v626_v31 = vadd.f32 %v1489_v62, %v625_v29 }
 0x213   :  { %v721_v33 = vmax.f32 %v631_v28, 0.0  ;;  %v811_v28 = vpop.permute.xlu0 %810  ;;  %v822_v29 = vshrl.u32 %v821_v27, 7  ;;  %vm835_vm1 = vcmp.lt.s32.totalorder %v821_v27, 256 }
 0x214   :  { %v720_v34 = vmax.f32 %v626_v31, 0.0  ;;  %v1123_v35 = vpop.f32.mrb[18].mxu1 }
 0x215   :  { %v641_v36 = vadd.f32 %v1123_v35, %v1489_v62  ;;  %v635_v37 = vpop.f32.mrb[19].mxu1 }
 0x216   :  { %v1182_v38 = vpack.c.bf16 %v721_v33, %v720_v34  ;;  %v636_v39 = vadd.f32 %v1489_v62, %v635_v37 }
 0x217   :  { %v723_v40 = vmax.f32 %v641_v36, 0.0 }
 0x218   :  { %v722_v41 = vmax.f32 %v636_v39, 0.0  ;;  %1183 = vmatprep.subr.bf16.mxu0 %v1182_v38  ;;  %v1126_v42 = vpop.f32.mrb[20].mxu1 }
 0x219   :  { %1185 = vmatpush3.bf16.xpose.msra.mxu0 %v1184_v44  ;;  %v651_v43 = vadd.f32 %v1126_v42, %v1489_v62  ;;  %v645_v45 = vpop.f32.mrb[21].mxu1 }
 0x21a   :  { %v1186_v46 = vpack.c.bf16 %v723_v40, %v722_v41  ;;  %v646_v47 = vadd.f32 %v1489_v62, %v645_v45 }
 0x21b   :  { %v725_v48 = vmax.f32 %v651_v43, 0.0 }
 0x21c   :  { %1187 = vmatprep.subr.bf16.mxu0 %v1186_v46  ;;  %v724_v49 = vmax.f32 %v646_v47, 0.0  ;;  %v1129_v50 = vpop.f32.mrb[22].mxu1 }
 0x21d   :  { %v661_v52 = vadd.f32 %v1129_v50, %v1489_v62  ;;  %v655_v53 = vpop.f32.mrb[23].mxu1 }
 0x21e   :  { %v1190_v54 = vpack.c.bf16 %v725_v48, %v724_v49  ;;  %v656_v55 = vadd.f32 %v1489_v62, %v655_v53 }
 0x21f   :  { %v727_v56 = vmax.f32 %v661_v52, 0.0 }
 0x220   :  { %v726_v57 = vmax.f32 %v656_v55, 0.0  ;;  %v1132_v59 = vpop.f32.mrb[24].mxu1 }
 0x221   :  { %1189 = vmatpush3.bf16.xpose.msra.mxu0 %v1496_v51  ;;  %v671_v44 = vadd.f32 %v1132_v59, %v1489_v62  ;;  %v665_v60 = vpop.f32.mrb[25].mxu1 }
 0x222   :  { %1191 = vmatprep.subr.bf16.mxu0 %v1190_v54  ;;  %v1194_v61 = vpack.c.bf16 %v727_v56, %v726_v57  ;;  %v666_v63 = vadd.f32 %v1489_v62, %v665_v60 }
 0x223   :  { %v729_v0 = vmax.f32 %v671_v44, 0.0 }
 0x224   :  { %v728_v1 = vmax.f32 %v666_v63, 0.0  ;;  %v1135_v3 = vpop.f32.mrb[26].mxu1 }
 0x225   :  { %v681_v4 = vadd.f32 %v1135_v3, %v1489_v62  ;;  %v675_v5 = vpop.f32.mrb[27].mxu1 }
 0x226   :  { %v1198_v6 = vpack.c.bf16 %v729_v0, %v728_v1  ;;  %v676_v7 = vadd.f32 %v1489_v62, %v675_v5 }
 0x227   :  { %v731_v8 = vmax.f32 %v681_v4, 0.0 }
 0x228   :  { %v730_v10 = vmax.f32 %v676_v7, 0.0  ;;  %v1138_v11 = vpop.f32.mrb[28].mxu1 }
 0x229   :  { %1193 = vmatpush3.bf16.xpose.msra.mxu0 %v1500_v58  ;;  %v691_v51 = vadd.f32 %v1138_v11, %v1489_v62  ;;  %v685_v12 = vpop.f32.mrb[29].mxu1 }
 0x22a   :  { %1195 = vmatprep.subr.bf16.mxu0 %v1194_v61  ;;  %v1202_v13 = vpack.c.bf16 %v731_v8, %v730_v10  ;;  %v686_v14 = vadd.f32 %v1489_v62, %v685_v12 }
 0x22b   :  { %v733_v15 = vmax.f32 %v691_v51, 0.0 }
 0x22c   :  { %v732_v17 = vmax.f32 %v686_v14, 0.0  ;;  %v1141_v18 = vpop.f32.mrb[30].mxu1 }
 0x22d   :  { %v701_v19 = vadd.f32 %v1141_v18, %v1489_v62  ;;  %v695_v20 = vpop.f32.mrb[31].mxu1 }
 0x22e   :  { %v1206_v21 = vpack.c.bf16 %v733_v15, %v732_v17  ;;  %v696_v22 = vadd.f32 %v1489_v62, %v695_v20  ;;  %v1323_v62 = vmov 1966171168  }
 0x22f   :  { %v735_v24 = vmax.f32 %v701_v19, 0.0  ;;  %v819_v26 = vunpack.c.l.s4 %v1323_v62 }
 0x230   :  { %v734_v25 = vmax.f32 %v696_v22, 0.0 }
 0x231   :  { %1197 = vmatpush3.bf16.xpose.msra.mxu0 %v1504_v2  ;;  %v820_v2 = vunpack.c.0.s8 %v819_v26 }
 0x232   :  { %1199 = vmatprep.subr.bf16.mxu0 %v1198_v6  ;;  %v1210_v58 = vpack.c.bf16 %v735_v24, %v734_v25 }
 0x233   :  { %v823_v35 = vsub.s32 %v820_v2, %v822_v29 }
 0x239   :  { %1201 = vmatpush3.bf16.xpose.msra.mxu0 %v1508_v9 }
 0x23a   :  { %1203 = vmatprep.subr.bf16.mxu0 %v1202_v13 }
 0x241   :  { %1205 = vmatpush3.bf16.xpose.msra.mxu0 %v1512_v16 }
 0x242   :  { %1207 = vmatprep.subr.bf16.mxu0 %v1206_v21 }
 0x249   :  { %1209 = vmatpush3.bf16.xpose.msra.mxu0 %v1516_v23 }
 0x24a   :  { %1211 = vmatprep.subr.bf16.mxu0 %v1210_v58 }
 0x251   :  { %1213 = vmatpush3.bf16.xpose.msra.mxu0 %v1520_v30 }
 0x258   :  { %1005 = vmatmul.mubr.f32.vlgmr.msra.gmra.mrb[32].mxu0 %v1480_v32 }
 0x32b   :  { %v803_v31 = vpop.f32.mrb[32].mxu0 }
 0x32c   :  { %v813_v33 = vadd.f32 %v811_v28, %v803_v31  ;;  %v805_v9 = vpop.f32.mrb[33].mxu0 }
 0x32d   :  { %v814_v34 = vadd.f32 %v811_v28, %v805_v9 }
 0x32f   :  { %v817_v16 = vcombine.low %v813_v33, %v814_v34 }
 0x331   :  { %v824_v36 = vrot.slane %v817_v16, %v823_v35 }
 0x333   :  { %v831_v23 = vrot.slane %v824_v36, %v823_v35 }
 0x335   :  { %837 = vst.msk [vmem:[#allocation8] sm:$0x3] %vm835_vm1, %v831_v23 }
 0x336   :  { %842 = vsyncadd [#allocation4], 16  ;;  %s1324_s3 = smov [#allocation8]  }
 0x337   :  { %s844_s4 = sshll.u32 %s1324_s3, 4  ;;  %s845_s4 = int_to_ptr.vmem [resolvable:$true] %s844_s4 }
 0x338   :  { %s1289_s12 = scalar_lea.vmem %s845_s4, 16  ;;  %s1293_s13 = scalar_lea.vmem %s845_s4, 32 }
 0x339   :  { %p1290_p10 = scmp.ne.s32.totalorder %s845_s4, %s1289_s12  ;;  %p1294_p11 = scmp.lt.s32.totalorder %s845_s4, %s845_s4 }
 0x33a   :  { %p1295_p12 = scmp.lt.s32.totalorder %s1293_s13, %s1289_s12 }
 0x33c   :  { %p1296_p13 = por %p1295_p12, %p1294_p11 }
 0x33e   :  { %p1297_p0 = pnand %p1296_p13, %p1290_p10 }
 0x340   :  { %1300 = shalt.err (!%p1297_p0)
}
 0x341   :  { %s1301_s16 = scalar_lea.hbm %s1562_s5, 16 }
 0x342   :  { %p1302_p1 = scmp.ne.s32.totalorder %s1562_s5, %s1301_s16  ;;  %p1305_p2 = scmp.lt.u32.totalorder %s1301_s16, %s1562_s5 }
 0x344   :  { %p1307_p3 = pnand %p1305_p2, %p1302_p1 }
 0x346   :  { %1310 = shalt.err (!%p1307_p3)
}
 0x347   :  { %847 = dma.vmem_to_hbm [thread:$0]  %s845_s4, 16, %s1562_s5, [#allocation4]  }
 0x348   :  { %1315 = dma.done.wait [#allocation4], 32  }
 0x349   :  { %1316 = vsyncadd [#allocation4], 4294967264 }
 0x34a   :  { %851 = vsyncpa [#allocation3], 1 }
 0x34b   :  { %852 = vsyncpa [#allocation6], 1 }
 0x34c   :  { %853 = vsyncpa [#allocation4], 1 }

</bundles_post_ra>
